<compile_context>
chip_gen: v5e
topology: v5e:2x2
jax: 0.10.0
libtpu: 0.0.40
codegen_flags: <defaults>
</compile_context>

<pallas_src>
import jax
import jax.numpy as jnp
from jax import lax
from jax.experimental import pallas as pl
from jax.experimental.pallas import tpu as pltpu

_BLOCK_H = 5120  # hidden-dim chunk: 10240 / 5120 = 2 grid steps


def _classification_kernel(x_ref, w1t_ref, w2_ref, o_ref):
    # x_ref:  (N, D_in)       bf16 flattened tokens (resident across all steps)
    # w1t_ref:(D_in, TH)      bf16 chunk of first Linear weight (pre-transposed)
    # w2_ref: (D_out, TH)     bf16 lane-dense chunk of second Linear weight
    # o_ref:  (N, D_out)      f32; used as logits accumulator, softmax'd at end
    k = pl.program_id(0)

    @pl.when(k == 0)
    def _():
        o_ref[...] = jnp.zeros_like(o_ref)

    # Linear 1 chunk (MXU, bf16 x bf16 -> f32) + LeakyReLU(0.01) (VPU)
    h = jnp.dot(x_ref[...], w1t_ref[...], preferred_element_type=jnp.float32)
    h = jnp.maximum(h, 0.01 * h)

    # Linear 2 chunk: contract hidden dim of h with hidden dim of the
    # lane-dense (D_out, TH) W2 tile  ==  h @ W2_chunk.T ; accumulate in f32.
    o_ref[...] += lax.dot_general(
        h.astype(w2_ref.dtype), w2_ref[...],
        dimension_numbers=(((1,), (1,)), ((), ())),
        preferred_element_type=jnp.float32)

    @pl.when(k == pl.num_programs(0) - 1)
    def _():
        logits = o_ref[...]
        m = jnp.max(logits, axis=-1, keepdims=True)
        e = jnp.exp(logits - m)
        # Exact division (not the approx EUP reciprocal) so rows sum to 1 to
        # f32 precision, matching PyTorch Softmax semantics.
        o_ref[...] = e / jnp.sum(e, axis=-1, keepdims=True)


def prepare_params(w1, w2, block_h=_BLOCK_H):
    """One-time weight prep (do NOT redo per forward call).

    w1: (H, D_in) PyTorch layout of the first Linear; w2: (D_out, H) of the
    second.  Returns bf16, H-padded (D_in, H_pad) and lane-dense (D_out, H_pad).
    """
    H, D_in = w1.shape
    D_out, _ = w2.shape
    H_pad = ((H + block_h - 1) // block_h) * block_h
    w1t = jnp.zeros((D_in, H_pad), jnp.bfloat16).at[:, :H].set(
        w1.T.astype(jnp.bfloat16))
    w2p = jnp.zeros((D_out, H_pad), jnp.bfloat16).at[:, :H].set(
        w2.astype(jnp.bfloat16))
    return w1t, w2p


def classification_forward(x, w1t, w2p, block_h=_BLOCK_H):
    """x: (B, S, D_in); w1t: (D_in, H_pad) bf16; w2p: (D_out, H_pad) bf16.
    Returns (B, S, D_out) f32 softmax probabilities."""
    B, S, D_in = x.shape
    D_out, H_pad = w2p.shape
    assert H_pad % block_h == 0
    N = B * S

    x2d = x.reshape(N, D_in).astype(jnp.bfloat16)
    num_h_chunks = H_pad // block_h

    out2d = pl.pallas_call(
        _classification_kernel,
        out_shape=jax.ShapeDtypeStruct((N, D_out), jnp.float32),
        grid=(num_h_chunks,),
        in_specs=[
            pl.BlockSpec((N, D_in), lambda k: (0, 0)),          # x: resident
            pl.BlockSpec((D_in, block_h), lambda k: (0, k)),    # W1t chunk
            pl.BlockSpec((D_out, block_h), lambda k: (0, k)),   # W2 chunk (lane-dense)
        ],
        out_specs=pl.BlockSpec((N, D_out), lambda k: (0, 0)),
        compiler_params=pltpu.CompilerParams(
            dimension_semantics=("arbitrary",),  # H is a reduction axis
        ),
    )(x2d, w1t, w2p)

    return out2d.reshape(B, S, D_out)


if __name__ == "__main__":
    # Small deterministic shapes consistent with the module's forward:
    # input (B, S, D_in); hidden dim fixed at 10000 by the module definition.
    B, S, D_in, H, D_out = 2, 8, 32, 10000, 16

    key = jax.random.PRNGKey(0)
    kx, k1, k2 = jax.random.split(key, 3)

    x = jax.random.normal(kx, (B, S, D_in), dtype=jnp.float32)
    # Deterministic synthetic weights (Kaiming-uniform-ish scaling like nn.Linear init)
    w1 = jax.random.uniform(k1, (H, D_in), dtype=jnp.float32,
                            minval=-1.0, maxval=1.0) * (1.0 / jnp.sqrt(D_in))
    w2 = jax.random.uniform(k2, (D_out, H), dtype=jnp.float32,
                            minval=-1.0, maxval=1.0) * (1.0 / jnp.sqrt(H))

    # One-time parameter prep (transpose + pad + bf16 cast), hoisted out of forward.
    w1t, w2p = prepare_params(w1, w2)

    out = classification_forward(x, w1t, w2p)
    out = jax.block_until_ready(out)
    assert out.shape == (B, S, D_out)

    # Sanity 1: softmax rows sum to 1 (exact f32 epilogue -> ~1e-6)
    row_sums = jnp.sum(out, axis=-1)
    assert bool(jnp.all(jnp.abs(row_sums - 1.0) < 1e-3))

    # Sanity 2: matches a pure-JAX f32 reference within bf16-weight tolerance
    h_ref = x.reshape(B * S, D_in) @ w1.T
    h_ref = jnp.where(h_ref >= 0, h_ref, 0.01 * h_ref)
    logits_ref = h_ref @ w2.T
    ref = jax.nn.softmax(logits_ref, axis=-1).reshape(B, S, D_out)
    assert bool(jnp.max(jnp.abs(out - ref)) < 5e-2)

    print("KERNEL_OK")
</pallas_src>

<mosaic_0001>
module attributes {stable_mosaic.version = 11 : i64} {
  func.func @_classification_kernel(%arg0: i32, %arg1: memref<16x32xbf16, #tpu.memory_space<vmem>>, %arg2: memref<32x5120xbf16, #tpu.memory_space<vmem>>, %arg3: memref<16x5120xbf16, #tpu.memory_space<vmem>>, %arg4: memref<16x16xf32, #tpu.memory_space<vmem>>) attributes {dimension_semantics = [#tpu.dimension_semantics<arbitrary>], iteration_bounds = array<i64: 2>, scalar_prefetch = 0 : i64, scratch_operands = 0 : i64, tpu.core_type = #tpu.core_type<tc>, window_params = [{pipeline_mode = #tpu.pipeline_mode<synchronous>, transform_indices = @transform_0, window_bounds = array<i64: 16, 32>}, {transform_indices = @transform_1, window_bounds = array<i64: 32, 5120>}, {transform_indices = @transform_2, window_bounds = array<i64: 16, 5120>}, {pipeline_mode = #tpu.pipeline_mode<synchronous>, transform_indices = @transform_3, window_bounds = array<i64: 16, 16>}]} {
    %c0_i32 = arith.constant 0 : i32
    %0 = arith.cmpi eq, %arg0, %c0_i32 : i32
    %1 = arith.extui %0 : i1 to i32
    %c0_i32_0 = arith.constant 0 : i32
    %2 = arith.cmpi ne, %1, %c0_i32_0 : i32
    scf.if %2 {
      %cst_13 = arith.constant 0.000000e+00 : f32
      %18 = vector.broadcast %cst_13 : f32 to vector<16x16xf32>
      %c0_14 = arith.constant 0 : index
      %c0_15 = arith.constant 0 : index
      %19 = vector.load %arg4[%c0_14, %c0_15] : memref<16x16xf32, #tpu.memory_space<vmem>>, vector<16x16xf32>
      tpu.vector_store %arg4[%c0_14, %c0_15], %18 {strides = array<i32>} : memref<16x16xf32, #tpu.memory_space<vmem>>, vector<16x16xf32>,
    } else {
    }
    %c0 = arith.constant 0 : index
    %c0_1 = arith.constant 0 : index
    %3 = vector.load %arg1[%c0, %c0_1] : memref<16x32xbf16, #tpu.memory_space<vmem>>, vector<16x32xbf16>
    %c0_2 = arith.constant 0 : index
    %c0_3 = arith.constant 0 : index
    %4 = vector.load %arg2[%c0_2, %c0_3] : memref<32x5120xbf16, #tpu.memory_space<vmem>>, vector<32x5120xbf16>
    %cst = arith.constant dense<0.000000e+00> : vector<16x5120xf32>
    %5 = tpu.matmul %3, %4, %cst {dimension_numbers = #tpu.dot_dimension_numbers<[1], [0], [0], [1], [0, 0, 1, 1], [], []>} : vector<16x32xbf16>, vector<32x5120xbf16>, vector<16x5120xf32> -> vector<16x5120xf32>
    %cst_4 = arith.constant 0.00999999977 : f32
    %6 = vector.broadcast %cst_4 : f32 to vector<16x5120xf32>
    %7 = arith.mulf %6, %5 : vector<16x5120xf32>
    %8 = arith.maximumf %5, %7 : vector<16x5120xf32>
    %c0_5 = arith.constant 0 : index
    %c0_6 = arith.constant 0 : index
    %9 = vector.load %arg4[%c0_5, %c0_6] : memref<16x16xf32, #tpu.memory_space<vmem>>, vector<16x16xf32>
    %10 = arith.truncf %8 : vector<16x5120xf32> to vector<16x5120xbf16>
    %c0_7 = arith.constant 0 : index
    %c0_8 = arith.constant 0 : index
    %11 = vector.load %arg3[%c0_7, %c0_8] : memref<16x5120xbf16, #tpu.memory_space<vmem>>, vector<16x5120xbf16>
    %cst_9 = arith.constant dense<0.000000e+00> : vector<16x16xf32>
    %12 = tpu.matmul %10, %11, %cst_9 {dimension_numbers = #tpu.dot_dimension_numbers<[1], [1], [0], [0], [0, 0, 1, 0], [], []>} : vector<16x5120xbf16>, vector<16x5120xbf16>, vector<16x16xf32> -> vector<16x16xf32>
    %13 = arith.addf %9, %12 : vector<16x16xf32>
    %c0_10 = arith.constant 0 : index
    %c0_11 = arith.constant 0 : index
    %14 = vector.load %arg4[%c0_10, %c0_11] : memref<16x16xf32, #tpu.memory_space<vmem>>, vector<16x16xf32>
    tpu.vector_store %arg4[%c0_10, %c0_11], %13 {strides = array<i32>} : memref<16x16xf32, #tpu.memory_space<vmem>>, vector<16x16xf32>,
    %c1_i32 = arith.constant 1 : i32
    %15 = arith.cmpi eq, %arg0, %c1_i32 : i32
    %16 = arith.extui %15 : i1 to i32
    %c0_i32_12 = arith.constant 0 : i32
    %17 = arith.cmpi ne, %16, %c0_i32_12 : i32
    scf.if %17 {
      %c0_13 = arith.constant 0 : index
      %c0_14 = arith.constant 0 : index
      %18 = vector.load %arg4[%c0_13, %c0_14] : memref<16x16xf32, #tpu.memory_space<vmem>>, vector<16x16xf32>
      %cst_15 = arith.constant dense<0xFF800000> : vector<16xf32>
      %19 = vector.multi_reduction <maximumf>, %18, %cst_15 [1] : vector<16x16xf32> to vector<16xf32>
      %20 = vector.shape_cast %19 : vector<16xf32> to vector<16x1xf32>
      %21 = vector.broadcast %20 : vector<16x1xf32> to vector<16x16xf32>
      %22 = arith.subf %18, %21 : vector<16x16xf32>
      %23 = math.exp %22 : vector<16x16xf32>
      %cst_16 = arith.constant dense<0.000000e+00> : vector<16xf32>
      %24 = vector.multi_reduction <add>, %23, %cst_16 [1] : vector<16x16xf32> to vector<16xf32>
      %25 = vector.shape_cast %24 : vector<16xf32> to vector<16x1xf32>
      %26 = vector.broadcast %25 : vector<16x1xf32> to vector<16x16xf32>
      %27 = arith.divf %23, %26 : vector<16x16xf32>
      %c0_17 = arith.constant 0 : index
      %c0_18 = arith.constant 0 : index
      %28 = vector.load %arg4[%c0_17, %c0_18] : memref<16x16xf32, #tpu.memory_space<vmem>>, vector<16x16xf32>
      tpu.vector_store %arg4[%c0_17, %c0_18], %27 {strides = array<i32>} : memref<16x16xf32, #tpu.memory_space<vmem>>, vector<16x16xf32>,
    } else {
    }
    return
  }
  func.func @transform_0(%arg0: i32) -> (i32, i32) {
    %c0_i32 = arith.constant 0 : i32
    %c0_i32_0 = arith.constant 0 : i32
    %c0_i32_1 = arith.constant 0 : i32
    return %c0_i32, %c0_i32_0 : i32, i32
  }
  func.func @transform_1(%arg0: i32) -> (i32, i32) {
    %c0_i32 = arith.constant 0 : i32
    %c0_i32_0 = arith.constant 0 : i32
    return %c0_i32, %arg0 : i32, i32
  }
  func.func @transform_2(%arg0: i32) -> (i32, i32) {
    %c0_i32 = arith.constant 0 : i32
    %c0_i32_0 = arith.constant 0 : i32
    return %c0_i32, %arg0 : i32, i32
  }
  func.func @transform_3(%arg0: i32) -> (i32, i32) {
    %c0_i32 = arith.constant 0 : i32
    %c0_i32_0 = arith.constant 0 : i32
    %c0_i32_1 = arith.constant 0 : i32
    return %c0_i32, %c0_i32_0 : i32, i32
  }
}

</mosaic_0001>

<bundles_post_ra>
// kernel: tpu_custom_call.1
= control target key start
LH: loop header
LB: loop body
LE: loop exit
PB: predicated region body
PF: predicated region fallthrough
CT: control target
= control target key end

     0   :  { %8 = vsyncpa [#allocation3], 0  ;;  %s4118_s0 = inlined_call_operand.hbm [shape: bf16[16,32], index: 0, kind: input, shape index: {}]   ;;  %s4119_s1 = inlined_call_operand.hbm [shape: bf16[32,10240], index: 1, kind: input, shape index: {}]   ;;  %s4120_s2 = inlined_call_operand.hbm [shape: bf16[16,10240], index: 2, kind: input, shape index: {}]   ;;  %s4121_s3 = inlined_call_operand.hbm [shape: f32[16,16], index: 3, kind: output, shape index: {}]  }
   0x1   :  { %9 = vsyncpa [#allocation6], 0 }
   0x2   :  { %11 = vsyncpa [#allocation6 + $0x1], 0 }
   0x3   :  { %12 = vsyncpa [#allocation4], 0  ;;  %s3387_s12 = smov 0   ;;  %s3389_s13 = smov 0  }
   0x4   :  { %s3391_s14 = smov 0   ;;  %s3393_s15 = smov 0  }
   0x5 LB: > { %s3408_s16 = sadd.s32 1, %s3355_s15   ;;  %s46_s17 = sadd.s32 1, %s3351_s14  ;;  %s3355_s15 = sphi %s3393_s15, %s4128_s15   ;;  %s3351_s14 = sphi %s3391_s14, %s4127_s14   ;;  %s3347_s13 = sphi %s3389_s13, %s4126_s13   ;;  %s3343_s12 = sphi %s3387_s12, %s4125_s12  }
   0x6   : > { %s43_s18 = ssub.s32 %s3355_s15, %s3408_s16  ;;  %p53_p0 = scmp.ne.s32.totalorder %s3351_s14, %s3347_s13 }
   0x7   : > { %p44_p1 = scmp.eq.s32.totalorder %s43_s18, 0  ;;  %p54_p2 = scmp.eq.s32.totalorder %s3355_s15, 0 }
   0x8   : > { %p3141_p3 = scmp.lt.s32.totalorder %s3355_s15, 2  ;;  %s144_s20 = sand.u32 1, %s3355_s15  }
   0x9   : > { %s3418_s19 = scalar_select %p44_p1, %s3351_s14, %s46_s17  }
   0xa   : > { %p55_p4 = por %p54_p2, %p53_p0  ;;  %s146_s21 = sand.u32 1, %s3351_s14  }
   0xb   : > { %s3113_s22 = smul.u32 640, %s146_s21  ;;  %s3432_s5 = scalar_lea.sflag [#allocation6], %s144_s20 }
   0xc   : > { %p3422_p5 = pnand %p3141_p3, %p55_p4  ;;  %s2990_s24 = smul.u32 160, %s3355_s15 }
   0xd   : > { %s148_s28 = scalar_lea.vmem [#allocation5], %s3113_s22  ;;  %s3114_s4 = smul.u32 320, %s146_s21 }
   0xe   : > { %s153_s27 = scalar_lea.hbm %s4119_s1, %s2990_s24  ;;  %s156_s29 = sshll.u32 %s148_s28, 4  ;;  %s157_s29 = int_to_ptr.vmem [resolvable:$true] %s156_s29 }
   0xf   : > { %s154_s30 = sshll.u32 %s153_s27, 4  ;;  %p3199_p7 = pneg %p3422_p5  ;;  %s155_s30 = int_to_ptr.hbm [resolvable:$true] %s154_s30 }
  0x10   : > { %s3195_s6 = sshra.s32 %s155_s30, 4  ;;  %s3202_s10 = scalar_lea.hbm %s4119_s1, 1280  ;;  %s3196_s6 = int_to_ptr.hbm [resolvable:$true] %s3195_s6 }
  0x11   : > { %s3197_s7 = scalar_lea.hbm %s3196_s6, 640  ;;  %p3203_p10 = scmp.lt.s32.totalorder %s3196_s6, %s4119_s1 }
  0x12   : > { %p3198_p6 = scmp.ne.s32.totalorder %s3196_s6, %s3197_s7  ;;  %p3204_p11 = scmp.lt.s32.totalorder %s3202_s10, %s3197_s7 }
  0x14   : > { %p3200_p8 = pnand %p3199_p7, %p3198_p6  ;;  %p3205_p12 = por %p3204_p11, %p3203_p10 }
  0x16   : > { %p3201_p9 = pneg %p3200_p8 }
  0x18   : > { %p3206_p13 = pnand %p3205_p12, %p3201_p9 }
  0x1a   : > { %3209 = shalt.err (!%p3206_p13)
}
  0x1b   : > { %s3357_s18 = smov 5120   ;;  %s3358_s20 = smov 2560  }
  0x1c   : > { %s3359_s21 = smov 160   ;;  %s170_s22 = scalar_lea.vmem [#allocation7], %s3114_s4 }
  0x1d   : > { %3136 = dma.hbm_to_vmem [thread:$0]  (!%p3422_p5), %s155_s30, 10240, %s157_s29, %s3432_s5, %s3357_s18, %s3358_s20, %s3359_s21  }
  0x1e   : > { %s3451_s25 = sshll.u32 %s170_s22, 4  ;;  %s3454_s26 = sadd.s32 4294967295, %s3355_s15   ;;  %s179_s25 = int_to_ptr.vmem [resolvable:$true] %s3451_s25 }
  0x1f   : > { %p59_p0 = scmp.ne.s32.totalorder %s3347_s13, %s3343_s12  ;;  %p60_p1 = scmp.eq.s32.totalorder %s3454_s26, 0 }
  0x20   : > { %p2453_p2 = scmp.ge.s32.totalorder %s3355_s15, 1  ;;  %p117_p3 = scmp.lt.s32.totalorder %s3355_s15, 3 }
  0x21   : > { %p2454_p4 = scmp.ne.s32.totalorder %s3454_s26, 0  ;;  %p3464_p6 = por %p60_p1, %p59_p0 }
  0x22   : > { %s128_s30 = sshll.u32 %s4118_s0, 4  ;;  %p3471_p8 = pnand %p2453_p2, %p117_p3  ;;  %s129_s30 = int_to_ptr.hbm [resolvable:$true] %s128_s30 }
  0x23   : > { %s3360_s12 = smov [#allocation2]   ;;  %s175_s9 = scalar_lea.hbm %s4120_s2, %s2990_s24 }
  0x24   : > { %p3129_p9 = pneg %p3471_p8  ;;  %s130_s6 = sshll.u32 %s3360_s12, 4  ;;  %s131_s6 = int_to_ptr.vmem [resolvable:$true] %s130_s6 }
  0x25   : > { %s176_s10 = sshll.u32 %s175_s9, 4  ;;  %s3361_s11 = smov 64   ;;  %s177_s10 = int_to_ptr.hbm [resolvable:$true] %s176_s10 }
  0x26   : > { %p3130_p10 = pnand %p3129_p9, %p60_p1  ;;  %s3362_s17 = smov 4  }
  0x27   : > { %s3255_s22 = sshra.s32 %s177_s10, 4  ;;  %s3262_s12 = scalar_lea.hbm %s4120_s2, 640  ;;  %s3256_s22 = int_to_ptr.hbm [resolvable:$true] %s3255_s22 }
  0x28   : > { %3132 = dma.hbm_to_vmem [thread:$0]  (!%p3130_p10), %s129_s30, 128, %s131_s6, [#allocation3], %s3361_s11, %s3361_s11, %s3362_s17  }
  0x29   : > { %s3257_s28 = scalar_lea.hbm %s3256_s22, 320  ;;  %p3263_p0 = scmp.lt.s32.totalorder %s3256_s22, %s4120_s2 }
  0x2a   : > { %p3258_p11 = scmp.ne.s32.totalorder %s3256_s22, %s3257_s28  ;;  %p3264_p2 = scmp.lt.s32.totalorder %s3262_s12, %s3257_s28 }
  0x2c   : > { %p3260_p12 = pnand %p3258_p11, %p3199_p7  ;;  %p3265_p3 = por %p3264_p2, %p3263_p0 }
  0x2e   : > { %p3261_p13 = pneg %p3260_p12 }
  0x30   : > { %p3266_p9 = pnand %p3265_p3, %p3261_p13 }
  0x32   : > { %3269 = shalt.err (!%p3266_p9)
}
  0x33   : > { %3139 = dma.hbm_to_vmem [thread:$0]  (!%p3422_p5), %s177_s10, 5120, %s179_s25, %s3432_s5, %s3357_s18, %s3358_s20, %s3359_s21  }
  0x34   : > { %190 = sbr.rel (%p3471_p8) target bundleno = 815 (0x32f), region = 32 }
  0x39   : > { %3330 = dma.done.wait (%p60_p1), [#allocation3], 128  }
  0x3a   : > { %3332 = vsyncadd (%p60_p1), [#allocation3], 4294967168  ;;  %s197_s30 = sand.u32 1, %s3454_s26   ;;  %s199_s6 = sand.u32 1, %s3347_s13  }
  0x3b   : > { %s3115_s23 = smul.u32 640, %s199_s6  ;;  %s198_s8 = scalar_lea.sflag [#allocation6], %s197_s30 }
  0x3d   : > { %s3508_s9 = scalar_lea.vmem [#allocation5], %s3115_s23 }
  0x3e   : > { %3334 = dma.done.wait (%p3464_p6), %s198_s8, 15360  }
  0x3f   : > { %3336 = vsyncadd (%p3464_p6), %s198_s8, 4294951936  ;;  %s3116_s5 = smul.u32 320, %s199_s6 }
  0x40   : > { %241 = sbr.rel (%p2454_p4) target bundleno = 72 (0x48), region = 48 }
  0x41   : > { %s3514_s18 = scalar_lea.vmem [#allocation7], %s3116_s5 }
  0x45   : > { %vm242_vm0 = vcmask 130048   ;;  %v3363_v0 = vmov 0.0  }
  0x46   : > { %243 = vst.msk [vmem:[#allocation8] sm:$0xff] %vm242_vm0, %v3363_v0 }
  0x47   : > { %244 = vst.msk [vmem:[#allocation8 + $0x8] sm:$0xff] %vm242_vm0, %v3363_v0 }
  0x48 PF: > { %v2627_v1 = vld [vmem:[%s3508_s9 + $0x140] sm:$0xf]  ;;  %v3033_v3 = vld [vmem:[%s3508_s9 + $0x144] sm:$0xf]  ;;  %v2635_v6 = vld [vmem:[%s3508_s9 + $0x148] sm:$0xf] }
  0x49   : > { %v3053_v2 = vld [vmem:[%s3508_s9 + $0x1dc] sm:$0xf0]  ;;  %v2629_v5 = vld [vmem:[%s3508_s9 + $0x1e0] sm:$0xf0]  ;;  %v3054_v7 = vld [vmem:[%s3508_s9 + $0x1e4] sm:$0xf0] }
  0x4a   : > { %v2628_v4 = vor.u32 %v3053_v2, %v2627_v1  ;;  %v2632_v8 = vor.u32 %v3033_v3, %v2629_v5  ;;  %v2636_v9 = vor.u32 %v3054_v7, %v2635_v6  ;;  %v3034_v10 = vld [vmem:[%s3508_s9 + $0x14c] sm:$0xf]  ;;  %v2467_v12 = vld [vmem:[%s3508_s9] sm:$0xf]  ;;  %v2993_v15 = vld [vmem:[%s3508_s9 + $0x4] sm:$0xf] }
  0x4b   : > { %v2637_v11 = vld [vmem:[%s3508_s9 + $0x1e8] sm:$0xf0]  ;;  %v3013_v14 = vld [vmem:[%s3508_s9 + $0x9c] sm:$0xf0]  ;;  %v2469_v16 = vld [vmem:[%s3508_s9 + $0xa0] sm:$0xf0] }
  0x4c   : > { %742 = vmatpush.bf16.msra.mxu0 %v2628_v4  ;;  %v2640_v13 = vor.u32 %v3034_v10, %v2637_v11  ;;  %756 = vmatpush.bf16.msra.mxu1 %v2632_v8  ;;  %v2468_v17 = vor.u32 %v3013_v14, %v2467_v12  ;;  %v2472_v18 = vor.u32 %v2993_v15, %v2469_v16  ;;  %v2475_v19 = vld [vmem:[%s3508_s9 + $0x8] sm:$0xf]  ;;  %v2994_v21 = vld [vmem:[%s3508_s9 + $0xc] sm:$0xf]  ;;  %v3534_v24 = vld [vmem:[#allocation2] sm:$0xff]  ;;  %vm732_vm1 = vcmask 261120  }
  0x4d   : > { %770 = vmatpush.bf16.msra.mxu2 %v2636_v9  ;;  %v3014_v20 = vld [vmem:[%s3508_s9 + $0xa4] sm:$0xf0]  ;;  %v2477_v23 = vld [vmem:[%s3508_s9 + $0xa8] sm:$0xf0]  ;;  %v2651_v25 = vld [vmem:[%s3508_s9 + $0x158] sm:$0xf] }
  0x4e   : > { %784 = vmatpush.bf16.msra.mxu3 %v2640_v13  ;;  %v2476_v22 = vor.u32 %v3014_v20, %v2475_v19  ;;  %v2480_v26 = vor.u32 %v2994_v21, %v2477_v23  ;;  %v3056_v27 = vld [vmem:[%s3508_s9 + $0x1f4] sm:$0xf0]  ;;  %v2643_v28 = vld [vmem:[%s3508_s9 + $0x150] sm:$0xf]  ;;  %v3036_v31 = vld [vmem:[%s3508_s9 + $0x15c] sm:$0xf] }
  0x4f   : > { %v3055_v29 = vld [vmem:[%s3508_s9 + $0x1ec] sm:$0xf0]  ;;  %v2652_v30 = vor.u32 %v3056_v27, %v2651_v25  ;;  %v2653_v32 = vld [vmem:[%s3508_s9 + $0x1f8] sm:$0xf0]  ;;  %v3035_v33 = vld [vmem:[%s3508_s9 + $0x154] sm:$0xf] }
  0x50   : > { %743 = vmatpush.bf16.msra.mxu0 %v2468_v17  ;;  %757 = vmatpush.bf16.msra.mxu1 %v2472_v18  ;;  %v2644_v34 = vor.u32 %v3055_v29, %v2643_v28  ;;  %v2656_v35 = vor.u32 %v3036_v31, %v2653_v32  ;;  %v2645_v36 = vld [vmem:[%s3508_s9 + $0x1f0] sm:$0xf0]  ;;  %v2491_v37 = vld [vmem:[%s3508_s9 + $0x18] sm:$0xf]  ;;  %v2483_v41 = vld [vmem:[%s3508_s9 + $0x10] sm:$0xf] }
  0x51   : > { %771 = vmatpush.bf16.msra.mxu2 %v2476_v22  ;;  %v3016_v38 = vld [vmem:[%s3508_s9 + $0xb4] sm:$0xf0]  ;;  %v2648_v39 = vor.u32 %v3035_v33, %v2645_v36  ;;  %v3015_v42 = vld [vmem:[%s3508_s9 + $0xac] sm:$0xf0]  ;;  %v2996_v43 = vld [vmem:[%s3508_s9 + $0x1c] sm:$0xf] }
  0x52   : > { %785 = vmatpush.bf16.msra.mxu3 %v2480_v26  ;;  %v2492_v40 = vor.u32 %v3016_v38, %v2491_v37  ;;  %v2493_v44 = vld [vmem:[%s3508_s9 + $0xb8] sm:$0xf0]  ;;  %v2995_v45 = vld [vmem:[%s3508_s9 + $0x14] sm:$0xf]  ;;  %v2667_v48 = vld [vmem:[%s3508_s9 + $0x168] sm:$0xf]  ;;  %v2484_v51 = vor.u32 %v3015_v42, %v2483_v41 }
  0x53   : > { %2785 = vmatmul.msk.bf16.vlgmr.msra.gmra.mxu0 %vm732_vm1, %v3534_v24  ;;  %v2485_v46 = vld [vmem:[%s3508_s9 + $0xb0] sm:$0xf0]  ;;  %2786 = vmatmul.msk.bf16.vlgmr.msra.gmra.mxu1 %vm732_vm1, %v3534_v24  ;;  %v2496_v47 = vor.u32 %v2996_v43, %v2493_v44  ;;  %v3058_v49 = vld [vmem:[%s3508_s9 + $0x204] sm:$0xf0]  ;;  %v2659_v50 = vld [vmem:[%s3508_s9 + $0x160] sm:$0xf] }
  0x54   : > { %2787 = vmatmul.msk.bf16.vlgmr.msra.gmra.mxu2 %vm732_vm1, %v3534_v24  ;;  %798 = vmatpush.bf16.msrb.mxu0 %v2644_v34  ;;  %v2668_v52 = vor.u32 %v3058_v49, %v2667_v48  ;;  %v3057_v53 = vld [vmem:[%s3508_s9 + $0x1fc] sm:$0xf0]  ;;  %v3038_v54 = vld [vmem:[%s3508_s9 + $0x16c] sm:$0xf]  ;;  %v2488_v56 = vor.u32 %v2995_v45, %v2485_v46  ;;  %v3037_v59 = vld [vmem:[%s3508_s9 + $0x164] sm:$0xf] }
  0x55   : > { %826 = vmatpush.bf16.msrb.mxu2 %v2652_v30  ;;  %2788 = vmatmul.msk.bf16.vlgmr.msra.gmra.mxu3 %vm732_vm1, %v3534_v24  ;;  %v2669_v55 = vld [vmem:[%s3508_s9 + $0x208] sm:$0xf0]  ;;  %v2660_v57 = vor.u32 %v3057_v53, %v2659_v50  ;;  %v2661_v60 = vld [vmem:[%s3508_s9 + $0x200] sm:$0xf0]  ;;  %v2507_v61 = vld [vmem:[%s3508_s9 + $0x28] sm:$0xf] }
  0x56   : > { %840 = vmatpush.bf16.msrb.mxu3 %v2656_v35  ;;  %812 = vmatpush.bf16.msrb.mxu1 %v2648_v39  ;;  %v2672_v58 = vor.u32 %v3038_v54, %v2669_v55  ;;  %v2664_v62 = vor.u32 %v3037_v59, %v2661_v60  ;;  %v3018_v63 = vld [vmem:[%s3508_s9 + $0xc4] sm:$0xf0]  ;;  %v2499_v0 = vld [vmem:[%s3508_s9 + $0x20] sm:$0xf]  ;;  %v2998_v3 = vld [vmem:[%s3508_s9 + $0x2c] sm:$0xf] }
  0x57   : > { %v3017_v1 = vld [vmem:[%s3508_s9 + $0xbc] sm:$0xf0]  ;;  %v2508_v2 = vor.u32 %v3018_v63, %v2507_v61  ;;  %v2509_v4 = vld [vmem:[%s3508_s9 + $0xc8] sm:$0xf0]  ;;  %v2997_v5 = vld [vmem:[%s3508_s9 + $0x24] sm:$0xf] }
  0x58   : > { %799 = vmatpush.bf16.msrb.mxu0 %v2484_v51  ;;  %v2512_v6 = vor.u32 %v2998_v3, %v2509_v4  ;;  %v2501_v7 = vld [vmem:[%s3508_s9 + $0xc0] sm:$0xf0]  ;;  %v2500_v8 = vor.u32 %v3017_v1, %v2499_v0  ;;  %v2683_v10 = vld [vmem:[%s3508_s9 + $0x178] sm:$0xf]  ;;  %v2675_v12 = vld [vmem:[%s3508_s9 + $0x170] sm:$0xf] }
  0x59   : > { %827 = vmatpush.bf16.msrb.mxu2 %v2492_v40  ;;  %v2504_v9 = vor.u32 %v2997_v5, %v2501_v7  ;;  %v3060_v11 = vld [vmem:[%s3508_s9 + $0x214] sm:$0xf0]  ;;  %v3059_v13 = vld [vmem:[%s3508_s9 + $0x20c] sm:$0xf0]  ;;  %v3040_v14 = vld [vmem:[%s3508_s9 + $0x17c] sm:$0xf] }
  0x5a   : > { %841 = vmatpush.bf16.msrb.mxu3 %v2496_v47  ;;  %813 = vmatpush.bf16.msrb.mxu1 %v2488_v56  ;;  %v2685_v15 = vld [vmem:[%s3508_s9 + $0x218] sm:$0xf0]  ;;  %v3039_v16 = vld [vmem:[%s3508_s9 + $0x174] sm:$0xf]  ;;  %v2684_v18 = vor.u32 %v3060_v11, %v2683_v10  ;;  %v2676_v19 = vor.u32 %v3059_v13, %v2675_v12  ;;  %v2523_v21 = vld [vmem:[%s3508_s9 + $0x38] sm:$0xf] }
  0x5b   : > { %v2677_v17 = vld [vmem:[%s3508_s9 + $0x210] sm:$0xf0]  ;;  %v2688_v20 = vor.u32 %v3040_v14, %v2685_v15  ;;  %v3020_v22 = vld [vmem:[%s3508_s9 + $0xd4] sm:$0xf0]  ;;  %v2515_v23 = vld [vmem:[%s3508_s9 + $0x30] sm:$0xf] }
  0x5c   : > { %854 = vmatpush.bf16.msra.mxu0 %v2660_v57  ;;  %v2680_v25 = vor.u32 %v3039_v16, %v2677_v17  ;;  %v3019_v26 = vld [vmem:[%s3508_s9 + $0xcc] sm:$0xf0]  ;;  %v3000_v27 = vld [vmem:[%s3508_s9 + $0x3c] sm:$0xf]  ;;  %v2999_v29 = vld [vmem:[%s3508_s9 + $0x34] sm:$0xf]  ;;  %v2524_v31 = vor.u32 %v3020_v22, %v2523_v21 }
  0x5d   : > { %882 = vmatpush.bf16.msra.mxu2 %v2668_v52  ;;  %v2525_v28 = vld [vmem:[%s3508_s9 + $0xd8] sm:$0xf0]  ;;  %v2517_v30 = vld [vmem:[%s3508_s9 + $0xd0] sm:$0xf0]  ;;  %v2516_v32 = vor.u32 %v3019_v26, %v2515_v23  ;;  %v2699_v35 = vld [vmem:[%s3508_s9 + $0x188] sm:$0xf] }
  0x5e   : > { %896 = vmatpush.bf16.msra.mxu3 %v2672_v58  ;;  %868 = vmatpush.bf16.msra.mxu1 %v2664_v62  ;;  %v2528_v33 = vor.u32 %v3000_v27, %v2525_v28  ;;  %v2520_v34 = vor.u32 %v2999_v29, %v2517_v30  ;;  %v3062_v36 = vld [vmem:[%s3508_s9 + $0x224] sm:$0xf0]  ;;  %v2691_v37 = vld [vmem:[%s3508_s9 + $0x180] sm:$0xf]  ;;  %v3042_v39 = vld [vmem:[%s3508_s9 + $0x18c] sm:$0xf] }
  0x5f   : > { %v3061_v38 = vld [vmem:[%s3508_s9 + $0x21c] sm:$0xf0]  ;;  %v2701_v40 = vld [vmem:[%s3508_s9 + $0x228] sm:$0xf0]  ;;  %v3041_v41 = vld [vmem:[%s3508_s9 + $0x184] sm:$0xf]  ;;  %v2700_v43 = vor.u32 %v3062_v36, %v2699_v35 }
  0x60   : > { %855 = vmatpush.bf16.msra.mxu0 %v2500_v8  ;;  %v2693_v42 = vld [vmem:[%s3508_s9 + $0x220] sm:$0xf0]  ;;  %v2692_v44 = vor.u32 %v3061_v38, %v2691_v37  ;;  %v2704_v45 = vor.u32 %v3042_v39, %v2701_v40  ;;  %v2539_v46 = vld [vmem:[%s3508_s9 + $0x48] sm:$0xf]  ;;  %v2531_v48 = vld [vmem:[%s3508_s9 + $0x40] sm:$0xf] }
  0x61   : > { %883 = vmatpush.bf16.msra.mxu2 %v2508_v2  ;;  %v3022_v47 = vld [vmem:[%s3508_s9 + $0xe4] sm:$0xf0]  ;;  %v2696_v49 = vor.u32 %v3041_v41, %v2693_v42  ;;  %v3021_v50 = vld [vmem:[%s3508_s9 + $0xdc] sm:$0xf0]  ;;  %v3002_v51 = vld [vmem:[%s3508_s9 + $0x4c] sm:$0xf] }
  0x62   : > { %897 = vmatpush.bf16.msra.mxu3 %v2512_v6  ;;  %869 = vmatpush.bf16.msra.mxu1 %v2504_v9  ;;  %v2541_v52 = vld [vmem:[%s3508_s9 + $0xe8] sm:$0xf0]  ;;  %v3001_v53 = vld [vmem:[%s3508_s9 + $0x44] sm:$0xf]  ;;  %v2540_v55 = vor.u32 %v3022_v47, %v2539_v46  ;;  %v2532_v56 = vor.u32 %v3021_v50, %v2531_v48  ;;  %v2715_v59 = vld [vmem:[%s3508_s9 + $0x198] sm:$0xf] }
  0x63   : > { %2789 = vmatmul.msk.bf16.vlgmr.msrb.gmra.mxu0 %vm732_vm1, %v3534_v24  ;;  %2790 = vmatmul.msk.bf16.vlgmr.msrb.gmra.mxu1 %vm732_vm1, %v3534_v24  ;;  %v2533_v54 = vld [vmem:[%s3508_s9 + $0xe0] sm:$0xf0]  ;;  %v2544_v57 = vor.u32 %v3002_v51, %v2541_v52  ;;  %v3064_v60 = vld [vmem:[%s3508_s9 + $0x234] sm:$0xf0]  ;;  %v2707_v61 = vld [vmem:[%s3508_s9 + $0x190] sm:$0xf] }
  0x64   : > { %2791 = vmatmul.msk.bf16.vlgmr.msrb.gmra.mxu2 %vm732_vm1, %v3534_v24  ;;  %910 = vmatpush.bf16.msrb.mxu0 %v2676_v19  ;;  %v2536_v58 = vor.u32 %v3001_v53, %v2533_v54  ;;  %v3063_v62 = vld [vmem:[%s3508_s9 + $0x22c] sm:$0xf0]  ;;  %v3044_v63 = vld [vmem:[%s3508_s9 + $0x19c] sm:$0xf]  ;;  %v3043_v1 = vld [vmem:[%s3508_s9 + $0x194] sm:$0xf]  ;;  %v2716_v3 = vor.u32 %v3064_v60, %v2715_v59 }
  0x65   : > { %2792 = vmatmul.msk.bf16.vlgmr.msrb.gmra.mxu3 %vm732_vm1, %v3534_v24  ;;  %938 = vmatpush.bf16.msrb.mxu2 %v2684_v18  ;;  %v2717_v0 = vld [vmem:[%s3508_s9 + $0x238] sm:$0xf0]  ;;  %v2709_v2 = vld [vmem:[%s3508_s9 + $0x230] sm:$0xf0]  ;;  %v2708_v4 = vor.u32 %v3063_v62, %v2707_v61  ;;  %v2555_v6 = vld [vmem:[%s3508_s9 + $0x58] sm:$0xf] }
  0x66   : > { %952 = vmatpush.bf16.msrb.mxu3 %v2688_v20  ;;  %924 = vmatpush.bf16.msrb.mxu1 %v2680_v25  ;;  %v2720_v5 = vor.u32 %v3044_v63, %v2717_v0  ;;  %v3024_v7 = vld [vmem:[%s3508_s9 + $0xf4] sm:$0xf0]  ;;  %v2547_v8 = vld [vmem:[%s3508_s9 + $0x50] sm:$0xf]  ;;  %v2712_v9 = vor.u32 %v3043_v1, %v2709_v2  ;;  %v3004_v11 = vld [vmem:[%s3508_s9 + $0x5c] sm:$0xf] }
  0x67   : > { %v3023_v10 = vld [vmem:[%s3508_s9 + $0xec] sm:$0xf0]  ;;  %v2557_v12 = vld [vmem:[%s3508_s9 + $0xf8] sm:$0xf0]  ;;  %v3003_v13 = vld [vmem:[%s3508_s9 + $0x54] sm:$0xf]  ;;  %v2556_v15 = vor.u32 %v3024_v7, %v2555_v6 }
  0x68   : > { %911 = vmatpush.bf16.msrb.mxu0 %v2516_v32  ;;  %v2549_v14 = vld [vmem:[%s3508_s9 + $0xf0] sm:$0xf0]  ;;  %v2548_v16 = vor.u32 %v3023_v10, %v2547_v8  ;;  %v2560_v17 = vor.u32 %v3004_v11, %v2557_v12  ;;  %v2731_v19 = vld [vmem:[%s3508_s9 + $0x1a8] sm:$0xf]  ;;  %v2723_v21 = vld [vmem:[%s3508_s9 + $0x1a0] sm:$0xf] }
  0x69   : > { %939 = vmatpush.bf16.msrb.mxu2 %v2524_v31  ;;  %v2552_v18 = vor.u32 %v3003_v13, %v2549_v14  ;;  %v3066_v20 = vld [vmem:[%s3508_s9 + $0x244] sm:$0xf0]  ;;  %v3065_v22 = vld [vmem:[%s3508_s9 + $0x23c] sm:$0xf0]  ;;  %v3046_v23 = vld [vmem:[%s3508_s9 + $0x1ac] sm:$0xf] }
  0x6a   : > { %953 = vmatpush.bf16.msrb.mxu3 %v2528_v33  ;;  %925 = vmatpush.bf16.msrb.mxu1 %v2520_v34  ;;  %v2733_v25 = vld [vmem:[%s3508_s9 + $0x248] sm:$0xf0]  ;;  %v3045_v26 = vld [vmem:[%s3508_s9 + $0x1a4] sm:$0xf]  ;;  %v2732_v28 = vor.u32 %v3066_v20, %v2731_v19  ;;  %v2724_v29 = vor.u32 %v3065_v22, %v2723_v21  ;;  %v2571_v31 = vld [vmem:[%s3508_s9 + $0x68] sm:$0xf] }
  0x6b   : > { %v2725_v27 = vld [vmem:[%s3508_s9 + $0x240] sm:$0xf0]  ;;  %v2736_v30 = vor.u32 %v3046_v23, %v2733_v25  ;;  %v3026_v32 = vld [vmem:[%s3508_s9 + $0x104] sm:$0xf0]  ;;  %v2563_v33 = vld [vmem:[%s3508_s9 + $0x60] sm:$0xf] }
  0x6c   : > { %v2728_v34 = vor.u32 %v3045_v26, %v2725_v27  ;;  %v3025_v35 = vld [vmem:[%s3508_s9 + $0xfc] sm:$0xf0]  ;;  %v3006_v36 = vld [vmem:[%s3508_s9 + $0x6c] sm:$0xf]  ;;  %v3005_v38 = vld [vmem:[%s3508_s9 + $0x64] sm:$0xf]  ;;  %v2572_v40 = vor.u32 %v3026_v32, %v2571_v31 }
  0x6d   : > { %v2573_v37 = vld [vmem:[%s3508_s9 + $0x108] sm:$0xf0]  ;;  %v2565_v39 = vld [vmem:[%s3508_s9 + $0x100] sm:$0xf0]  ;;  %v2564_v41 = vor.u32 %v3025_v35, %v2563_v33  ;;  %v2739_v46 = vld [vmem:[%s3508_s9 + $0x1b0] sm:$0xf] }
  0x6e   : > { %v2576_v42 = vor.u32 %v3006_v36, %v2573_v37  ;;  %v3067_v47 = vld [vmem:[%s3508_s9 + $0x24c] sm:$0xf0]  ;;  %v3048_v48 = vld [vmem:[%s3508_s9 + $0x1bc] sm:$0xf]  ;;  %v3047_v50 = vld [vmem:[%s3508_s9 + $0x1b4] sm:$0xf] }
  0x6f   : > { %v2741_v51 = vld [vmem:[%s3508_s9 + $0x250] sm:$0xf0]  ;;  %v2740_v53 = vor.u32 %v3067_v47, %v2739_v46  ;;  %v3027_v59 = vld [vmem:[%s3508_s9 + $0x10c] sm:$0xf0]  ;;  %v3008_v60 = vld [vmem:[%s3508_s9 + $0x7c] sm:$0xf] }
  0x70   : > { %v2589_v61 = vld [vmem:[%s3508_s9 + $0x118] sm:$0xf0]  ;;  %v3007_v62 = vld [vmem:[%s3508_s9 + $0x74] sm:$0xf]  ;;  %v2755_v6 = vld [vmem:[%s3508_s9 + $0x1c0] sm:$0xf] }
  0x71   : > { %v2581_v63 = vld [vmem:[%s3508_s9 + $0x110] sm:$0xf0]  ;;  %v2592_v2 = vor.u32 %v3008_v60, %v2589_v61  ;;  %v3069_v7 = vld [vmem:[%s3508_s9 + $0x25c] sm:$0xf0]  ;;  %v3050_v8 = vld [vmem:[%s3508_s9 + $0x1cc] sm:$0xf] }
  0x72   : > { %v3049_v10 = vld [vmem:[%s3508_s9 + $0x1c4] sm:$0xf]  ;;  %v2756_v13 = vor.u32 %v3069_v7, %v2755_v6  ;;  %v3029_v19 = vld [vmem:[%s3508_s9 + $0x11c] sm:$0xf0]  ;;  %v3010_v20 = vld [vmem:[%s3508_s9 + $0x8c] sm:$0xf] }
  0x73   : > { %2793 = vmatmul.msk.bf16.vlgmr.msra.gmra.mxu0 %vm732_vm1, %v3534_v24  ;;  %2794 = vmatmul.msk.bf16.vlgmr.msra.gmra.mxu1 %vm732_vm1, %v3534_v24  ;;  %v2757_v11 = vld [vmem:[%s3508_s9 + $0x260] sm:$0xf0]  ;;  %v2605_v21 = vld [vmem:[%s3508_s9 + $0x128] sm:$0xf0]  ;;  %v2771_v31 = vld [vmem:[%s3508_s9 + $0x1d0] sm:$0xf] }
  0x74   : > { %2795 = vmatmul.msk.bf16.vlgmr.msra.gmra.mxu2 %vm732_vm1, %v3534_v24  ;;  %966 = vmatpush.bf16.msra.mxu0 %v2692_v44  ;;  %v2747_v44 = vld [vmem:[%s3508_s9 + $0x1b8] sm:$0xf]  ;;  %v3009_v22 = vld [vmem:[%s3508_s9 + $0x84] sm:$0xf]  ;;  %v2608_v27 = vor.u32 %v3010_v20, %v2605_v21  ;;  %v3071_v32 = vld [vmem:[%s3508_s9 + $0x26c] sm:$0xf0] }
  0x75   : > { %2796 = vmatmul.msk.bf16.vlgmr.msra.gmra.mxu3 %vm732_vm1, %v3534_v24  ;;  %994 = vmatpush.bf16.msra.mxu2 %v2700_v43  ;;  %v2568_v43 = vor.u32 %v3005_v38, %v2565_v39  ;;  %v2597_v23 = vld [vmem:[%s3508_s9 + $0x120] sm:$0xf0]  ;;  %v3052_v33 = vld [vmem:[%s3508_s9 + $0x1dc] sm:$0xf]  ;;  %v3051_v35 = vld [vmem:[%s3508_s9 + $0x1d4] sm:$0xf]  ;;  %v2772_v38 = vor.u32 %v3071_v32, %v2771_v31 }
  0x76   : > { %1008 = vmatpush.bf16.msra.mxu3 %v2704_v45  ;;  %980 = vmatpush.bf16.msra.mxu1 %v2696_v49  ;;  %v3068_v45 = vld [vmem:[%s3508_s9 + $0x254] sm:$0xf0]  ;;  %v2749_v49 = vld [vmem:[%s3508_s9 + $0x258] sm:$0xf0]  ;;  %v2773_v36 = vld [vmem:[%s3508_s9 + $0x270] sm:$0xf0] }
  0x77   : > { %v2748_v52 = vor.u32 %v3068_v45, %v2747_v44  ;;  %v2752_v54 = vor.u32 %v3048_v48, %v2749_v49  ;;  %v3031_v44 = vld [vmem:[%s3508_s9 + $0x12c] sm:$0xf0]  ;;  %v3012_v45 = vld [vmem:[%s3508_s9 + $0x9c] sm:$0xf]  ;;  %v3011_v47 = vld [vmem:[%s3508_s9 + $0x94] sm:$0xf] }
  0x78   : > { %967 = vmatpush.bf16.msra.mxu0 %v2532_v56  ;;  %v3028_v56 = vld [vmem:[%s3508_s9 + $0x114] sm:$0xf0]  ;;  %v2621_v46 = vld [vmem:[%s3508_s9 + $0x138] sm:$0xf0]  ;;  %v2613_v48 = vld [vmem:[%s3508_s9 + $0x130] sm:$0xf0] }
  0x79   : > { %995 = vmatpush.bf16.msra.mxu2 %v2540_v55  ;;  %v2587_v55 = vld [vmem:[%s3508_s9 + $0x78] sm:$0xf]  ;;  %v3073_v60 = vld [vmem:[%s3514_s18 + $0x4] sm:$0xf]  ;;  %vm2300_vm2 = vcmask 130048   ;;  %p2985_p5 = scmp.ne.s32.totalorder %s3454_s26, 1 }
  0x7a   : > { %1009 = vmatpush.bf16.msra.mxu3 %v2544_v57  ;;  %981 = vmatpush.bf16.msra.mxu1 %v2536_v58  ;;  %v2579_v57 = vld [vmem:[%s3508_s9 + $0x70] sm:$0xf]  ;;  %v2744_v58 = vor.u32 %v3047_v50, %v2741_v51  ;;  %v2588_v0 = vor.u32 %v3028_v56, %v2587_v55  ;;  %v2624_v51 = vor.u32 %v3012_v45, %v2621_v46  ;;  %v2827_v55 = vld [vmem:[%s3514_s18] sm:$0xf]  ;;  %v2829_v61 = vld [vmem:[%s3514_s18 + $0xa0] sm:$0xf0] }
  0x7b   : > { %v2580_v1 = vor.u32 %v3027_v59, %v2579_v57  ;;  %v3093_v56 = vld [vmem:[%s3514_s18 + $0x9c] sm:$0xf0]  ;;  %v3074_v57 = vld [vmem:[%s3514_s18 + $0xc] sm:$0xf]  ;;  %v2851_v7 = vld [vmem:[%s3514_s18 + $0x18] sm:$0xf] }
  0x7c   : > { %v3078_v45 = vld [vmem:[%s3514_s18 + $0x2c] sm:$0xf] }
  0x7d   : > { %v2869_v46 = vld [vmem:[%s3514_s18 + $0xc8] sm:$0xf0] }
  0x83   : > { %2797 = vmatmul.msk.bf16.vlgmr.msrb.gmra.mxu0 %vm732_vm1, %v3534_v24  ;;  %2798 = vmatmul.msk.bf16.vlgmr.msrb.gmra.mxu1 %vm732_vm1, %v3534_v24 }
  0x84   : > { %2799 = vmatmul.msk.bf16.vlgmr.msrb.gmra.mxu2 %vm732_vm1, %v3534_v24  ;;  %1022 = vmatpush.bf16.msrb.mxu0 %v2708_v4  ;;  %v2763_v4 = vld [vmem:[%s3508_s9 + $0x1c8] sm:$0xf] }
  0x85   : > { %2800 = vmatmul.msk.bf16.vlgmr.msrb.gmra.mxu3 %vm732_vm1, %v3534_v24  ;;  %1050 = vmatpush.bf16.msrb.mxu2 %v2716_v3  ;;  %v2584_v3 = vor.u32 %v3007_v62, %v2581_v63 }
  0x86   : > { %1064 = vmatpush.bf16.msrb.mxu3 %v2720_v5  ;;  %1036 = vmatpush.bf16.msrb.mxu1 %v2712_v9  ;;  %v3070_v5 = vld [vmem:[%s3508_s9 + $0x264] sm:$0xf0]  ;;  %v2765_v9 = vld [vmem:[%s3508_s9 + $0x268] sm:$0xf0] }
  0x87   : > { %v2764_v12 = vor.u32 %v3070_v5, %v2763_v4  ;;  %v2768_v14 = vor.u32 %v3050_v8, %v2765_v9  ;;  %v3096_v8 = vld [vmem:[%s3514_s18 + $0xb4] sm:$0xf0]  ;;  %v2843_v9 = vld [vmem:[%s3514_s18 + $0x10] sm:$0xf] }
  0x88   : > { %1023 = vmatpush.bf16.msrb.mxu0 %v2548_v16  ;;  %v3030_v16 = vld [vmem:[%s3508_s9 + $0x124] sm:$0xf0] }
  0x89   : > { %1051 = vmatpush.bf16.msrb.mxu2 %v2556_v15  ;;  %v2603_v15 = vld [vmem:[%s3508_s9 + $0x88] sm:$0xf] }
  0x8a   : > { %1065 = vmatpush.bf16.msrb.mxu3 %v2560_v17  ;;  %1037 = vmatpush.bf16.msrb.mxu1 %v2552_v18  ;;  %v2595_v17 = vld [vmem:[%s3508_s9 + $0x80] sm:$0xf]  ;;  %v2760_v18 = vor.u32 %v3049_v10, %v2757_v11  ;;  %v2604_v25 = vor.u32 %v3030_v16, %v2603_v15  ;;  %v3095_v11 = vld [vmem:[%s3514_s18 + $0xac] sm:$0xf0]  ;;  %v3075_v16 = vld [vmem:[%s3514_s18 + $0x14] sm:$0xf] }
  0x8b   : > { %v2596_v26 = vor.u32 %v3029_v19, %v2595_v17  ;;  %v2845_v17 = vld [vmem:[%s3514_s18 + $0xb0] sm:$0xf0]  ;;  %v2852_v19 = vor.u32 %v3096_v8, %v2851_v7  ;;  %v2844_v20 = vor.u32 %v3095_v11, %v2843_v9 }
  0x93   : > { %2801 = vmatmul.msk.bf16.vlgmr.msra.gmra.mxu0 %vm732_vm1, %v3534_v24  ;;  %2802 = vmatmul.msk.bf16.vlgmr.msra.gmra.mxu1 %vm732_vm1, %v3534_v24 }
  0x94   : > { %2803 = vmatmul.msk.bf16.vlgmr.msra.gmra.mxu2 %vm732_vm1, %v3534_v24  ;;  %1078 = vmatpush.bf16.msra.mxu0 %v2724_v29  ;;  %v2779_v29 = vld [vmem:[%s3508_s9 + $0x1d8] sm:$0xf] }
  0x95   : > { %2804 = vmatmul.msk.bf16.vlgmr.msra.gmra.mxu3 %vm732_vm1, %v3534_v24  ;;  %1106 = vmatpush.bf16.msra.mxu2 %v2732_v28  ;;  %v2600_v28 = vor.u32 %v3009_v22, %v2597_v23  ;;  %v2848_v22 = vor.u32 %v3075_v16, %v2845_v17  ;;  %v3100_v16 = vld [vmem:[%s3514_s18 + $0xd4] sm:$0xf0]  ;;  %v2875_v17 = vld [vmem:[%s3514_s18 + $0x30] sm:$0xf] }
  0x96   : > { %1120 = vmatpush.bf16.msra.mxu3 %v2736_v30  ;;  %1092 = vmatpush.bf16.msra.mxu1 %v2728_v34  ;;  %v3072_v30 = vld [vmem:[%s3508_s9 + $0x274] sm:$0xf0]  ;;  %v2781_v34 = vld [vmem:[%s3508_s9 + $0x278] sm:$0xf0] }
  0x97   : > { %v2780_v37 = vor.u32 %v3072_v30, %v2779_v29  ;;  %v2784_v39 = vor.u32 %v3052_v33, %v2781_v34 }
  0x98   : > { %1079 = vmatpush.bf16.msra.mxu0 %v2564_v41  ;;  %v3032_v41 = vld [vmem:[%s3508_s9 + $0x134] sm:$0xf0] }
  0x99   : > { %1107 = vmatpush.bf16.msra.mxu2 %v2572_v40  ;;  %v2619_v40 = vld [vmem:[%s3508_s9 + $0x98] sm:$0xf] }
  0x9a   : > { %1121 = vmatpush.bf16.msra.mxu3 %v2576_v42  ;;  %1093 = vmatpush.bf16.msra.mxu1 %v2568_v43  ;;  %v2611_v42 = vld [vmem:[%s3508_s9 + $0x90] sm:$0xf]  ;;  %v2776_v43 = vor.u32 %v3051_v35, %v2773_v36  ;;  %v2620_v49 = vor.u32 %v3032_v41, %v2619_v40  ;;  %v2859_v40 = vld [vmem:[%s3514_s18 + $0x20] sm:$0xf] }
  0x9b   : > { %v2612_v50 = vor.u32 %v3031_v44, %v2611_v42  ;;  %v3097_v44 = vld [vmem:[%s3514_s18 + $0xbc] sm:$0xf0] }
  0xa3   : > { %2805 = vmatmul.msk.bf16.vlgmr.msrb.gmra.mxu0 %vm732_vm1, %v3534_v24  ;;  %2806 = vmatmul.msk.bf16.vlgmr.msrb.gmra.mxu1 %vm732_vm1, %v3534_v24 }
  0xa4   : > { %2807 = vmatmul.msk.bf16.vlgmr.msrb.gmra.mxu2 %vm732_vm1, %v3534_v24  ;;  %1134 = vmatpush.bf16.msrb.mxu0 %v2740_v53  ;;  %v2835_v53 = vld [vmem:[%s3514_s18 + $0x8] sm:$0xf] }
  0xa5   : > { %2808 = vmatmul.msk.bf16.vlgmr.msrb.gmra.mxu3 %vm732_vm1, %v3534_v24  ;;  %1162 = vmatpush.bf16.msrb.mxu2 %v2748_v52  ;;  %v2616_v52 = vor.u32 %v3011_v47, %v2613_v48 }
  0xa6   : > { %1176 = vmatpush.bf16.msrb.mxu3 %v2752_v54  ;;  %1148 = vmatpush.bf16.msrb.mxu1 %v2744_v58  ;;  %v3094_v54 = vld [vmem:[%s3514_s18 + $0xa4] sm:$0xf0]  ;;  %v2837_v58 = vld [vmem:[%s3514_s18 + $0xa8] sm:$0xf0] }
  0xa7   : > { %v2836_v63 = vor.u32 %v3094_v54, %v2835_v53 }
  0xa8   : > { %1135 = vmatpush.bf16.msrb.mxu0 %v2580_v1  ;;  %v2840_v1 = vor.u32 %v3074_v57, %v2837_v58 }
  0xa9   : > { %1163 = vmatpush.bf16.msrb.mxu2 %v2588_v0  ;;  %v2828_v0 = vor.u32 %v3093_v56, %v2827_v55 }
  0xaa   : > { %1177 = vmatpush.bf16.msrb.mxu3 %v2592_v2  ;;  %1149 = vmatpush.bf16.msrb.mxu1 %v2584_v3  ;;  %v2832_v2 = vor.u32 %v3073_v60, %v2829_v61  ;;  %v2872_v60 = vor.u32 %v3078_v45, %v2869_v46 }
  0xb3   : > { %2809 = vmatmul.msk.bf16.vlgmr.msra.gmra.mxu0 %vm732_vm1, %v3534_v24  ;;  %2810 = vmatmul.msk.bf16.vlgmr.msra.gmra.mxu1 %vm732_vm1, %v3534_v24 }
  0xb4   : > { %2811 = vmatmul.msk.bf16.vlgmr.msra.gmra.mxu2 %vm732_vm1, %v3534_v24  ;;  %1190 = vmatpush.bf16.msra.mxu0 %v2756_v13  ;;  %v2853_v13 = vld [vmem:[%s3514_s18 + $0xb8] sm:$0xf0] }
  0xb5   : > { %2812 = vmatmul.msk.bf16.vlgmr.msra.gmra.mxu3 %vm732_vm1, %v3534_v24  ;;  %1218 = vmatpush.bf16.msra.mxu2 %v2764_v12  ;;  %v3076_v12 = vld [vmem:[%s3514_s18 + $0x1c] sm:$0xf] }
  0xb6   : > { %1232 = vmatpush.bf16.msra.mxu3 %v2768_v14  ;;  %1204 = vmatpush.bf16.msra.mxu1 %v2760_v18  ;;  %v2856_v21 = vor.u32 %v3076_v12, %v2853_v13 }
  0xb8   : > { %1191 = vmatpush.bf16.msra.mxu0 %v2596_v26 }
  0xb9   : > { %1219 = vmatpush.bf16.msra.mxu2 %v2604_v25 }
  0xba   : > { %1233 = vmatpush.bf16.msra.mxu3 %v2608_v27  ;;  %1205 = vmatpush.bf16.msra.mxu1 %v2600_v28 }
  0xc3   : > { %2813 = vmatmul.msk.bf16.vlgmr.msrb.gmra.mxu0 %vm732_vm1, %v3534_v24  ;;  %2814 = vmatmul.msk.bf16.vlgmr.msrb.gmra.mxu1 %vm732_vm1, %v3534_v24 }
  0xc4   : > { %2815 = vmatmul.msk.bf16.vlgmr.msrb.gmra.mxu2 %vm732_vm1, %v3534_v24  ;;  %1246 = vmatpush.bf16.msrb.mxu0 %v2772_v38  ;;  %v2867_v38 = vld [vmem:[%s3514_s18 + $0x28] sm:$0xf] }
  0xc5   : > { %2816 = vmatmul.msk.bf16.vlgmr.msrb.gmra.mxu3 %vm732_vm1, %v3534_v24  ;;  %1274 = vmatpush.bf16.msrb.mxu2 %v2780_v37 }
  0xc6   : > { %1288 = vmatpush.bf16.msrb.mxu3 %v2784_v39  ;;  %1260 = vmatpush.bf16.msrb.mxu1 %v2776_v43  ;;  %v3098_v39 = vld [vmem:[%s3514_s18 + $0xc4] sm:$0xf0] }
  0xc7   : > { %v2868_v56 = vor.u32 %v3098_v39, %v2867_v38 }
  0xc8   : > { %1247 = vmatpush.bf16.msrb.mxu0 %v2612_v50 }
  0xc9   : > { %1275 = vmatpush.bf16.msrb.mxu2 %v2620_v49 }
  0xca   : > { %1289 = vmatpush.bf16.msrb.mxu3 %v2624_v51  ;;  %1261 = vmatpush.bf16.msrb.mxu1 %v2616_v52  ;;  %v3077_v51 = vld [vmem:[%s3514_s18 + $0x24] sm:$0xf] }
  0xcb   : > { %v2861_v52 = vld [vmem:[%s3514_s18 + $0xc0] sm:$0xf0] }
  0xd0   : > { %v3750_v59 = vpop.f32.mrf.mxu0  ;;  %v3754_v62 = vpop.f32.mrf.mxu1 }
  0xd1   : > { %v1297_v32 = vmul.f32 0.01, %v3754_v62 }
  0xd3   : > { %2817 = vmatmul.msk.bf16.vlgmr.msra.gmra.mxu0 %vm732_vm1, %v3534_v24  ;;  %2818 = vmatmul.msk.bf16.vlgmr.msra.gmra.mxu1 %vm732_vm1, %v3534_v24  ;;  %v1377_v47 = vmax.f32 %v3754_v62, %v1297_v32  ;;  %v2864_v62 = vor.u32 %v3077_v51, %v2861_v52  ;;  %v2877_v32 = vld [vmem:[%s3514_s18 + $0xd0] sm:$0xf0] }
  0xd4   : > { %2819 = vmatmul.msk.bf16.vlgmr.msra.gmra.mxu2 %vm732_vm1, %v3534_v24  ;;  %1745 = vmatpush.bf16.xpose.msra.mxu0 %v2828_v0 }
  0xd5   : > { %2820 = vmatmul.msk.bf16.vlgmr.msra.gmra.mxu3 %vm732_vm1, %v3534_v24  ;;  %1773 = vmatpush.bf16.xpose.msra.mxu2 %v2836_v63 }
  0xd6   : > { %1787 = vmatpush.bf16.xpose.msra.mxu3 %v2840_v1  ;;  %1759 = vmatpush.bf16.xpose.msra.mxu1 %v2832_v2 }
  0xd7   : > { %v3764_v3 = vpop.f32.mrf.mxu2 }
  0xd8   : > { %v3766_v4 = vpop.f32.mrf.mxu3  ;;  %v747_v5 = vpop.f32.mrf.mxu0  ;;  %v1298_v33 = vmul.f32 0.01, %v3764_v3 }
  0xd9   : > { %v761_v6 = vpop.f32.mrf.mxu1  ;;  %v1336_v27 = vmul.f32 0.01, %v747_v5  ;;  %v1299_v34 = vmul.f32 0.01, %v3766_v4 }
  0xda   : > { %v1337_v29 = vmul.f32 0.01, %v761_v6  ;;  %v1378_v48 = vmax.f32 %v3764_v3, %v1298_v33 }
  0xdb   : > { %v1416_v35 = vmax.f32 %v747_v5, %v1336_v27  ;;  %v1379_v53 = vmax.f32 %v3766_v4, %v1299_v34  ;;  %v3080_v27 = vld [vmem:[%s3514_s18 + $0x3c] sm:$0xf] }
  0xdc   : > { %v1417_v36 = vmax.f32 %v761_v6, %v1337_v29  ;;  %v2885_v29 = vld [vmem:[%s3514_s18 + $0xd8] sm:$0xf0] }
  0xdd   : > { %v2888_v39 = vor.u32 %v3080_v27, %v2885_v29 }
  0xde   : > { %v1459_v57 = vpack.c.bf16 %v1417_v36, %v1377_v47 }
  0xdf   : > { %v775_v10 = vpop.f32.mrf.mxu2 }
  0xe0   : > { %v789_v14 = vpop.f32.mrf.mxu3  ;;  %v3774_v15 = vpop.f32.mrf.mxu0  ;;  %v1338_v30 = vmul.f32 0.01, %v775_v10 }
  0xe1   : > { %v3778_v18 = vpop.f32.mrf.mxu1  ;;  %v1339_v31 = vmul.f32 0.01, %v789_v14  ;;  %v1300_v6 = vmul.f32 0.01, %v3774_v15 }
  0xe2   : > { %v1418_v37 = vmax.f32 %v775_v10, %v1338_v30  ;;  %v1301_v8 = vmul.f32 0.01, %v3778_v18 }
  0xe3   : > { %2821 = vmatmul.msk.bf16.vlgmr.msrb.gmra.mxu0 %vm732_vm1, %v3534_v24  ;;  %2822 = vmatmul.msk.bf16.vlgmr.msrb.gmra.mxu1 %vm732_vm1, %v3534_v24  ;;  %v1419_v42 = vmax.f32 %v789_v14, %v1339_v31  ;;  %v2883_v14 = vld [vmem:[%s3514_s18 + $0x38] sm:$0xf]  ;;  %v3079_v31 = vld [vmem:[%s3514_s18 + $0x34] sm:$0xf] }
  0xe4   : > { %2823 = vmatmul.msk.bf16.vlgmr.msrb.gmra.mxu2 %vm732_vm1, %v3534_v24  ;;  %1801 = vmatpush.bf16.xpose.msrb.mxu0 %v2844_v20  ;;  %v1460_v58 = vpack.c.bf16 %v1418_v37, %v1378_v48  ;;  %v1381_v30 = vmax.f32 %v3778_v18, %v1301_v8  ;;  %v2880_v18 = vor.u32 %v3079_v31, %v2877_v32  ;;  %v2893_v8 = vld [vmem:[%s3514_s18 + $0xe0] sm:$0xf0] }
  0xe5   : > { %2824 = vmatmul.msk.bf16.vlgmr.msrb.gmra.mxu3 %vm732_vm1, %v3534_v24  ;;  %1829 = vmatpush.bf16.xpose.msrb.mxu2 %v2852_v19  ;;  %v1296_v24 = vmul.f32 0.01, %v3750_v59  ;;  %v1461_v61 = vpack.c.bf16 %v1419_v42, %v1379_v53  ;;  %v1380_v19 = vmax.f32 %v3774_v15, %v1300_v6  ;;  %v2884_v15 = vor.u32 %v3100_v16, %v2883_v14 }
  0xe6   : > { %1843 = vmatpush.bf16.xpose.msrb.mxu3 %v2856_v21  ;;  %1815 = vmatpush.bf16.xpose.msrb.mxu1 %v2848_v22  ;;  %v3099_v22 = vld [vmem:[%s3514_s18 + $0xcc] sm:$0xf0] }
  0xe7   : > { %v3788_v23 = vpop.f32.mrf.mxu2  ;;  %v1376_v41 = vmax.f32 %v3750_v59, %v1296_v24  ;;  %v2860_v59 = vor.u32 %v3097_v44, %v2859_v40  ;;  %v2876_v38 = vor.u32 %v3099_v22, %v2875_v17 }
  0xe8   : > { %v3790_v25 = vpop.f32.mrf.mxu3  ;;  %v3792_v26 = vpop.f32.mrf.mxu0  ;;  %v1302_v9 = vmul.f32 0.01, %v3788_v23 }
  0xe9   : > { %v3794_v28 = vpop.f32.mrf.mxu1  ;;  %v1458_v54 = vpack.c.bf16 %v1416_v35, %v1376_v41  ;;  %v1340_v2 = vmul.f32 0.01, %v3792_v26  ;;  %v1303_v10 = vmul.f32 0.01, %v3790_v25 }
  0xea   : > { %v1341_v4 = vmul.f32 0.01, %v3794_v28 }
  0xeb   : > { %v1420_v11 = vmax.f32 %v3792_v26, %v1340_v2  ;;  %v1382_v26 = vmax.f32 %v3788_v23, %v1302_v9  ;;  %v1383_v33 = vmax.f32 %v3790_v25, %v1303_v10  ;;  %v3082_v2 = vld [vmem:[%s3514_s18 + $0x4c] sm:$0xf] }
  0xec   : > { %v1421_v12 = vmax.f32 %v3794_v28, %v1341_v4  ;;  %v2901_v4 = vld [vmem:[%s3514_s18 + $0xe8] sm:$0xf0] }
  0xed   : > { %v1462_v34 = vpack.c.bf16 %v1420_v11, %v1380_v19  ;;  %v2904_v16 = vor.u32 %v3082_v2, %v2901_v4 }
  0xee   : > { %v1463_v36 = vpack.c.bf16 %v1421_v12, %v1381_v30 }
  0xef   : > { %v3804_v43 = vpop.f32.mrf.mxu2 }
  0xf0   : > { %v845_v49 = vpop.f32.mrf.mxu3  ;;  %v3811_v50 = vpop.f32.mrf.mxu0  ;;  %v1342_v5 = vmul.f32 0.01, %v3804_v43 }
  0xf1   : > { %v3816_v55 = vpop.f32.mrf.mxu1  ;;  %v1343_v7 = vmul.f32 0.01, %v845_v49  ;;  %v1304_v46 = vmul.f32 0.01, %v3811_v50 }
  0xf2   : > { %v1422_v13 = vmax.f32 %v3804_v43, %v1342_v5  ;;  %v1305_v48 = vmul.f32 0.01, %v3816_v55 }
  0xf3   : > { %1746 = vmatmul.bf16.vlgmr.msra.gmra.mxu0 %v1458_v54  ;;  %1760 = vmatmul.bf16.vlgmr.msra.gmra.mxu1 %v1459_v57  ;;  %v1423_v20 = vmax.f32 %v845_v49, %v1343_v7  ;;  %v3102_v57 = vld [vmem:[%s3514_s18 + $0xe4] sm:$0xf0]  ;;  %v3081_v7 = vld [vmem:[%s3514_s18 + $0x44] sm:$0xf] }
  0xf4   : > { %1774 = vmatmul.bf16.vlgmr.msra.gmra.mxu2 %v1460_v58  ;;  %1857 = vmatpush.bf16.xpose.msra.mxu0 %v2860_v59  ;;  %v1464_v37 = vpack.c.bf16 %v1422_v13, %v1382_v26  ;;  %v2891_v58 = vld [vmem:[%s3514_s18 + $0x40] sm:$0xf]  ;;  %v1384_v59 = vmax.f32 %v3811_v50, %v1304_v46  ;;  %v1385_v5 = vmax.f32 %v3816_v55, %v1305_v48  ;;  %v2909_v48 = vld [vmem:[%s3514_s18 + $0xf0] sm:$0xf0] }
  0xf5   : > { %1788 = vmatmul.bf16.vlgmr.msra.gmra.mxu3 %v1461_v61  ;;  %1885 = vmatpush.bf16.xpose.msra.mxu2 %v2868_v56  ;;  %v1465_v40 = vpack.c.bf16 %v1423_v20, %v1383_v33  ;;  %v2899_v56 = vld [vmem:[%s3514_s18 + $0x48] sm:$0xf]  ;;  %v2896_v55 = vor.u32 %v3081_v7, %v2893_v8 }
  0xf6   : > { %1899 = vmatpush.bf16.xpose.msra.mxu3 %v2872_v60  ;;  %1871 = vmatpush.bf16.xpose.msra.mxu1 %v2864_v62  ;;  %v3101_v62 = vld [vmem:[%s3514_s18 + $0xdc] sm:$0xf0]  ;;  %v2900_v50 = vor.u32 %v3102_v57, %v2899_v56 }
  0xf7   : > { %v3818_v63 = vpop.f32.mrf.mxu2  ;;  %v2892_v14 = vor.u32 %v3101_v62, %v2891_v58 }
  0xf8   : > { %v3820_v0 = vpop.f32.mrf.mxu3  ;;  %v3822_v1 = vpop.f32.mrf.mxu0  ;;  %v1306_v49 = vmul.f32 0.01, %v3818_v63 }
  0xf9   : > { %v3825_v3 = vpop.f32.mrf.mxu1  ;;  %v1344_v42 = vmul.f32 0.01, %v3822_v1  ;;  %v1307_v51 = vmul.f32 0.01, %v3820_v0 }
  0xfa   : > { %v1345_v44 = vmul.f32 0.01, %v3825_v3 }
  0xfb   : > { %v1424_v52 = vmax.f32 %v3822_v1, %v1344_v42  ;;  %v1386_v1 = vmax.f32 %v3818_v63, %v1306_v49  ;;  %v1387_v9 = vmax.f32 %v3820_v0, %v1307_v51  ;;  %v3084_v42 = vld [vmem:[%s3514_s18 + $0x5c] sm:$0xf] }
  0xfc   : > { %v1425_v53 = vmax.f32 %v3825_v3, %v1345_v44  ;;  %v2917_v44 = vld [vmem:[%s3514_s18 + $0xf8] sm:$0xf0] }
  0xfd   : > { %v1466_v10 = vpack.c.bf16 %v1424_v52, %v1384_v59  ;;  %v2920_v57 = vor.u32 %v3084_v42, %v2917_v44 }
  0xfe   : > { %v1467_v12 = vpack.c.bf16 %v1425_v53, %v1385_v5 }
  0xff   : > { %v3840_v21 = vpop.f32.mrf.mxu2 }
 0x100   : > { %v901_v24 = vpop.f32.mrf.mxu3  ;;  %v3847_v28 = vpop.f32.mrf.mxu0  ;;  %v1346_v45 = vmul.f32 0.01, %v3840_v21 }
 0x101   : > { %v3852_v35 = vpop.f32.mrf.mxu1  ;;  %v1347_v47 = vmul.f32 0.01, %v901_v24  ;;  %v1308_v29 = vmul.f32 0.01, %v3847_v28 }
 0x102   : > { %v1426_v54 = vmax.f32 %v3840_v21, %v1346_v45  ;;  %v1309_v26 = vmul.f32 0.01, %v3852_v35 }
 0x103   : > { %1802 = vmatmul.bf16.vlgmr.msrb.gmra.mxu0 %v1462_v34  ;;  %1816 = vmatmul.bf16.vlgmr.msrb.gmra.mxu1 %v1463_v36  ;;  %v1427_v60 = vmax.f32 %v901_v24, %v1347_v47  ;;  %v3104_v36 = vld [vmem:[%s3514_s18 + $0xf4] sm:$0xf0]  ;;  %v3083_v47 = vld [vmem:[%s3514_s18 + $0x54] sm:$0xf] }
 0x104   : > { %1830 = vmatmul.bf16.vlgmr.msrb.gmra.mxu2 %v1464_v37  ;;  %1913 = vmatpush.bf16.xpose.msrb.mxu0 %v2876_v38  ;;  %v1468_v13 = vpack.c.bf16 %v1426_v54, %v1386_v1  ;;  %v2907_v37 = vld [vmem:[%s3514_s18 + $0x50] sm:$0xf]  ;;  %v1388_v38 = vmax.f32 %v3847_v28, %v1308_v29  ;;  %v1389_v45 = vmax.f32 %v3852_v35, %v1309_v26  ;;  %v2925_v26 = vld [vmem:[%s3514_s18 + $0x100] sm:$0xf0] }
 0x105   : > { %1844 = vmatmul.bf16.vlgmr.msrb.gmra.mxu3 %v1465_v40  ;;  %1941 = vmatpush.bf16.xpose.msrb.mxu2 %v2884_v15  ;;  %v1469_v17 = vpack.c.bf16 %v1427_v60, %v1387_v9  ;;  %v2915_v15 = vld [vmem:[%s3514_s18 + $0x58] sm:$0xf]  ;;  %v2912_v35 = vor.u32 %v3083_v47, %v2909_v48 }
 0x106   : > { %1955 = vmatpush.bf16.xpose.msrb.mxu3 %v2888_v39  ;;  %1927 = vmatpush.bf16.xpose.msrb.mxu1 %v2880_v18  ;;  %v3103_v18 = vld [vmem:[%s3514_s18 + $0xec] sm:$0xf0]  ;;  %v2916_v28 = vor.u32 %v3104_v36, %v2915_v15 }
 0x107   : > { %v3854_v23 = vpop.f32.mrf.mxu2  ;;  %v2908_v56 = vor.u32 %v3103_v18, %v2907_v37 }
 0x108   : > { %v3856_v25 = vpop.f32.mrf.mxu3  ;;  %v3858_v41 = vpop.f32.mrf.mxu0  ;;  %v1310_v24 = vmul.f32 0.01, %v3854_v23 }
 0x109   : > { %v3861_v43 = vpop.f32.mrf.mxu1  ;;  %v1348_v20 = vmul.f32 0.01, %v3858_v41  ;;  %v1311_v31 = vmul.f32 0.01, %v3856_v25 }
 0x10a   : > { %v1349_v22 = vmul.f32 0.01, %v3861_v43 }
 0x10b   : > { %v1428_v32 = vmax.f32 %v3858_v41, %v1348_v20  ;;  %v1390_v41 = vmax.f32 %v3854_v23, %v1310_v24  ;;  %v1391_v49 = vmax.f32 %v3856_v25, %v1311_v31  ;;  %v3086_v20 = vld [vmem:[%s3514_s18 + $0x6c] sm:$0xf] }
 0x10c   : > { %v1429_v33 = vmax.f32 %v3861_v43, %v1349_v22  ;;  %v2933_v22 = vld [vmem:[%s3514_s18 + $0x108] sm:$0xf0] }
 0x10d   : > { %v1470_v51 = vpack.c.bf16 %v1428_v32, %v1388_v38  ;;  %v2936_v36 = vor.u32 %v3086_v20, %v2933_v22 }
 0x10e   : > { %v1471_v53 = vpack.c.bf16 %v1429_v33, %v1389_v45 }
 0x10f   : > { %v3876_v61 = vpop.f32.mrf.mxu2 }
 0x110   : > { %v957_v6 = vpop.f32.mrf.mxu3  ;;  %v3883_v3 = vpop.f32.mrf.mxu0  ;;  %v1350_v27 = vmul.f32 0.01, %v3876_v61 }
 0x111   : > { %v3888_v11 = vpop.f32.mrf.mxu1  ;;  %v1351_v30 = vmul.f32 0.01, %v957_v6  ;;  %v1312_v4 = vmul.f32 0.01, %v3883_v3 }
 0x112   : > { %v1430_v34 = vmax.f32 %v3876_v61, %v1350_v27  ;;  %v1313_v1 = vmul.f32 0.01, %v3888_v11 }
 0x113   : > { %1858 = vmatmul.bf16.vlgmr.msra.gmra.mxu0 %v1466_v10  ;;  %1872 = vmatmul.bf16.vlgmr.msra.gmra.mxu1 %v1467_v12  ;;  %v1431_v39 = vmax.f32 %v957_v6, %v1351_v30  ;;  %v3106_v12 = vld [vmem:[%s3514_s18 + $0x104] sm:$0xf0]  ;;  %v3085_v30 = vld [vmem:[%s3514_s18 + $0x64] sm:$0xf] }
 0x114   : > { %1886 = vmatmul.bf16.vlgmr.msra.gmra.mxu2 %v1468_v13  ;;  %1969 = vmatpush.bf16.xpose.msra.mxu0 %v2892_v14  ;;  %v1472_v54 = vpack.c.bf16 %v1430_v34, %v1390_v41  ;;  %v2923_v13 = vld [vmem:[%s3514_s18 + $0x60] sm:$0xf]  ;;  %v1392_v14 = vmax.f32 %v3883_v3, %v1312_v4  ;;  %v1393_v27 = vmax.f32 %v3888_v11, %v1313_v1  ;;  %v2941_v1 = vld [vmem:[%s3514_s18 + $0x110] sm:$0xf0] }
 0x115   : > { %1900 = vmatmul.bf16.vlgmr.msra.gmra.mxu3 %v1469_v17  ;;  %1997 = vmatpush.bf16.xpose.msra.mxu2 %v2900_v50  ;;  %v1473_v58 = vpack.c.bf16 %v1431_v39, %v1391_v49  ;;  %v2931_v50 = vld [vmem:[%s3514_s18 + $0x68] sm:$0xf]  ;;  %v2928_v11 = vor.u32 %v3085_v30, %v2925_v26 }
 0x116   : > { %2011 = vmatpush.bf16.xpose.msra.mxu3 %v2904_v16  ;;  %1983 = vmatpush.bf16.xpose.msra.mxu1 %v2896_v55  ;;  %v3105_v55 = vld [vmem:[%s3514_s18 + $0xfc] sm:$0xf0]  ;;  %v2932_v3 = vor.u32 %v3106_v12, %v2931_v50 }
 0x117   : > { %v3890_v63 = vpop.f32.mrf.mxu2  ;;  %v2924_v15 = vor.u32 %v3105_v55, %v2923_v13 }
 0x118   : > { %v3892_v0 = vpop.f32.mrf.mxu3  ;;  %v3894_v19 = vpop.f32.mrf.mxu0  ;;  %v1314_v6 = vmul.f32 0.01, %v3890_v63 }
 0x119   : > { %v3897_v21 = vpop.f32.mrf.mxu1  ;;  %v1352_v60 = vmul.f32 0.01, %v3894_v19  ;;  %v1315_v7 = vmul.f32 0.01, %v3892_v0 }
 0x11a   : > { %v1353_v62 = vmul.f32 0.01, %v3897_v21 }
 0x11b   : > { %v1432_v8 = vmax.f32 %v3894_v19, %v1352_v60  ;;  %v1394_v19 = vmax.f32 %v3890_v63, %v1314_v6  ;;  %v1395_v24 = vmax.f32 %v3892_v0, %v1315_v7  ;;  %v3088_v60 = vld [vmem:[%s3514_s18 + $0x7c] sm:$0xf] }
 0x11c   : > { %v1433_v9 = vmax.f32 %v3897_v21, %v1353_v62  ;;  %v2949_v62 = vld [vmem:[%s3514_s18 + $0x118] sm:$0xf0] }
 0x11d   : > { %v1474_v31 = vpack.c.bf16 %v1432_v8, %v1392_v14  ;;  %v2952_v12 = vor.u32 %v3088_v60, %v2949_v62 }
 0x11e   : > { %v1475_v33 = vpack.c.bf16 %v1433_v9, %v1393_v27 }
 0x11f   : > { %v3912_v40 = vpop.f32.mrf.mxu2 }
 0x120   : > { %v1013_v46 = vpop.f32.mrf.mxu3  ;;  %v3919_v43 = vpop.f32.mrf.mxu0  ;;  %v1354_v2 = vmul.f32 0.01, %v3912_v40 }
 0x121   : > { %v3924_v52 = vpop.f32.mrf.mxu1  ;;  %v1355_v5 = vmul.f32 0.01, %v1013_v46  ;;  %v1316_v44 = vmul.f32 0.01, %v3919_v43 }
 0x122   : > { %v1434_v10 = vmax.f32 %v3912_v40, %v1354_v2  ;;  %v1317_v41 = vmul.f32 0.01, %v3924_v52 }
 0x123   : > { %1914 = vmatmul.bf16.vlgmr.msrb.gmra.mxu0 %v1470_v51  ;;  %1928 = vmatmul.bf16.vlgmr.msrb.gmra.mxu1 %v1471_v53  ;;  %v1435_v16 = vmax.f32 %v1013_v46, %v1355_v5  ;;  %v3108_v53 = vld [vmem:[%s3514_s18 + $0x114] sm:$0xf0]  ;;  %v3087_v5 = vld [vmem:[%s3514_s18 + $0x74] sm:$0xf] }
 0x124   : > { %1942 = vmatmul.bf16.vlgmr.msrb.gmra.mxu2 %v1472_v54  ;;  %2025 = vmatpush.bf16.xpose.msrb.mxu0 %v2908_v56  ;;  %v1476_v34 = vpack.c.bf16 %v1434_v10, %v1394_v19  ;;  %v2939_v54 = vld [vmem:[%s3514_s18 + $0x70] sm:$0xf]  ;;  %v1396_v56 = vmax.f32 %v3919_v43, %v1316_v44  ;;  %v1397_v2 = vmax.f32 %v3924_v52, %v1317_v41  ;;  %v2957_v41 = vld [vmem:[%s3514_s18 + $0x120] sm:$0xf0] }
 0x125   : > { %1956 = vmatmul.bf16.vlgmr.msrb.gmra.mxu3 %v1473_v58  ;;  %2053 = vmatpush.bf16.xpose.msrb.mxu2 %v2916_v28  ;;  %v1477_v37 = vpack.c.bf16 %v1435_v16, %v1395_v24  ;;  %v2947_v28 = vld [vmem:[%s3514_s18 + $0x78] sm:$0xf]  ;;  %v2944_v52 = vor.u32 %v3087_v5, %v2941_v1 }
 0x126   : > { %2067 = vmatpush.bf16.xpose.msrb.mxu3 %v2920_v57  ;;  %2039 = vmatpush.bf16.xpose.msrb.mxu1 %v2912_v35  ;;  %v3107_v35 = vld [vmem:[%s3514_s18 + $0x10c] sm:$0xf0]  ;;  %v2948_v43 = vor.u32 %v3108_v53, %v2947_v28 }
 0x127   : > { %v3926_v23 = vpop.f32.mrf.mxu2  ;;  %v2940_v50 = vor.u32 %v3107_v35, %v2939_v54 }
 0x128   : > { %v3928_v25 = vpop.f32.mrf.mxu3  ;;  %v3930_v59 = vpop.f32.mrf.mxu0  ;;  %v1318_v46 = vmul.f32 0.01, %v3926_v23 }
 0x129   : > { %v3933_v61 = vpop.f32.mrf.mxu1  ;;  %v1356_v39 = vmul.f32 0.01, %v3930_v59  ;;  %v1319_v47 = vmul.f32 0.01, %v3928_v25 }
 0x12a   : > { %v1357_v18 = vmul.f32 0.01, %v3933_v61 }
 0x12b   : > { %v1436_v48 = vmax.f32 %v3930_v59, %v1356_v39  ;;  %v1398_v59 = vmax.f32 %v3926_v23, %v1318_v46  ;;  %v1399_v6 = vmax.f32 %v3928_v25, %v1319_v47  ;;  %v3090_v39 = vld [vmem:[%s3514_s18 + $0x8c] sm:$0xf] }
 0x12c   : > { %v1437_v49 = vmax.f32 %v3933_v61, %v1357_v18  ;;  %v2965_v18 = vld [vmem:[%s3514_s18 + $0x128] sm:$0xf0] }
 0x12d   : > { %v1478_v7 = vpack.c.bf16 %v1436_v48, %v1396_v56  ;;  %v2968_v53 = vor.u32 %v3090_v39, %v2965_v18 }
 0x12e   : > { %v1479_v9 = vpack.c.bf16 %v1437_v49, %v1397_v2 }
 0x12f   : > { %v3948_v17 = vpop.f32.mrf.mxu2 }
 0x130   : > { %v1069_v29 = vpop.f32.mrf.mxu3  ;;  %v3955_v21 = vpop.f32.mrf.mxu0  ;;  %v1358_v42 = vmul.f32 0.01, %v3948_v17 }
 0x131   : > { %v3960_v32 = vpop.f32.mrf.mxu1  ;;  %v1359_v45 = vmul.f32 0.01, %v1069_v29  ;;  %v1320_v22 = vmul.f32 0.01, %v3955_v21 }
 0x132   : > { %v1438_v51 = vmax.f32 %v3948_v17, %v1358_v42  ;;  %v1321_v19 = vmul.f32 0.01, %v3960_v32 }
 0x133   : > { %1970 = vmatmul.bf16.vlgmr.msra.gmra.mxu0 %v1474_v31  ;;  %1984 = vmatmul.bf16.vlgmr.msra.gmra.mxu1 %v1475_v33  ;;  %v1439_v57 = vmax.f32 %v1069_v29, %v1359_v45  ;;  %v3110_v33 = vld [vmem:[%s3514_s18 + $0x124] sm:$0xf0]  ;;  %v3089_v45 = vld [vmem:[%s3514_s18 + $0x84] sm:$0xf] }
 0x134   : > { %1998 = vmatmul.bf16.vlgmr.msra.gmra.mxu2 %v1476_v34  ;;  %2081 = vmatpush.bf16.xpose.msra.mxu0 %v2924_v15  ;;  %v1480_v10 = vpack.c.bf16 %v1438_v51, %v1398_v59  ;;  %v2955_v34 = vld [vmem:[%s3514_s18 + $0x80] sm:$0xf]  ;;  %v1400_v15 = vmax.f32 %v3955_v21, %v1320_v22  ;;  %v1401_v42 = vmax.f32 %v3960_v32, %v1321_v19  ;;  %v2973_v19 = vld [vmem:[%s3514_s18 + $0x130] sm:$0xf0] }
 0x135   : > { %2012 = vmatmul.bf16.vlgmr.msra.gmra.mxu3 %v1477_v37  ;;  %2109 = vmatpush.bf16.xpose.msra.mxu2 %v2932_v3  ;;  %v1481_v13 = vpack.c.bf16 %v1439_v57, %v1399_v6  ;;  %v2963_v3 = vld [vmem:[%s3514_s18 + $0x88] sm:$0xf]  ;;  %v2960_v32 = vor.u32 %v3089_v45, %v2957_v41 }
 0x136   : > { %2123 = vmatpush.bf16.xpose.msra.mxu3 %v2936_v36  ;;  %2095 = vmatpush.bf16.xpose.msra.mxu1 %v2928_v11  ;;  %v3109_v11 = vld [vmem:[%s3514_s18 + $0x11c] sm:$0xf0]  ;;  %v2964_v21 = vor.u32 %v3110_v33, %v2963_v3 }
 0x137   : > { %v3962_v63 = vpop.f32.mrf.mxu2  ;;  %v2956_v28 = vor.u32 %v3109_v11, %v2955_v34 }
 0x138   : > { %v3964_v0 = vpop.f32.mrf.mxu3  ;;  %v3966_v38 = vpop.f32.mrf.mxu0  ;;  %v1322_v29 = vmul.f32 0.01, %v3962_v63 }
 0x139   : > { %v3969_v40 = vpop.f32.mrf.mxu1  ;;  %v1360_v16 = vmul.f32 0.01, %v3966_v38  ;;  %v1323_v30 = vmul.f32 0.01, %v3964_v0 }
 0x13a   : > { %v1361_v55 = vmul.f32 0.01, %v3969_v40 }
 0x13b   : > { %v1440_v26 = vmax.f32 %v3966_v38, %v1360_v16  ;;  %v1402_v38 = vmax.f32 %v3962_v63, %v1322_v29  ;;  %v1403_v46 = vmax.f32 %v3964_v0, %v1323_v30  ;;  %v3092_v16 = vld [vmem:[%s3514_s18 + $0x9c] sm:$0xf] }
 0x13c   : > { %v1441_v24 = vmax.f32 %v3969_v40, %v1361_v55  ;;  %v2981_v55 = vld [vmem:[%s3514_s18 + $0x138] sm:$0xf0] }
 0x13d   : > { %v1482_v47 = vpack.c.bf16 %v1440_v26, %v1400_v15  ;;  %v2984_v33 = vor.u32 %v3092_v16, %v2981_v55 }
 0x13e   : > { %v1483_v49 = vpack.c.bf16 %v1441_v24, %v1401_v42 }
 0x13f   : > { %v3984_v58 = vpop.f32.mrf.mxu2 }
 0x140   : > { %v1125_v4 = vpop.f32.mrf.mxu3  ;;  %v3991_v61 = vpop.f32.mrf.mxu0  ;;  %v1362_v20 = vmul.f32 0.01, %v3984_v58 }
 0x141   : > { %v3996_v8 = vpop.f32.mrf.mxu1  ;;  %v1363_v27 = vmul.f32 0.01, %v1125_v4  ;;  %v1324_v62 = vmul.f32 0.01, %v3991_v61 }
 0x142   : > { %v1442_v31 = vmax.f32 %v3984_v58, %v1362_v20  ;;  %v1325_v59 = vmul.f32 0.01, %v3996_v8 }
 0x143   : > { %2026 = vmatmul.bf16.vlgmr.msrb.gmra.mxu0 %v1478_v7  ;;  %2040 = vmatmul.bf16.vlgmr.msrb.gmra.mxu1 %v1479_v9  ;;  %v1443_v36 = vmax.f32 %v1125_v4, %v1363_v27  ;;  %v3112_v9 = vld [vmem:[%s3514_s18 + $0x134] sm:$0xf0] }
 0x144   : > { %2054 = vmatmul.bf16.vlgmr.msrb.gmra.mxu2 %v1480_v10  ;;  %2137 = vmatpush.bf16.xpose.msrb.mxu0 %v2940_v50  ;;  %v1484_v51 = vpack.c.bf16 %v1442_v31, %v1402_v38  ;;  %v2971_v10 = vld [vmem:[%s3514_s18 + $0x90] sm:$0xf]  ;;  %v1404_v50 = vmax.f32 %v3991_v61, %v1324_v62  ;;  %v1405_v20 = vmax.f32 %v3996_v8, %v1325_v59 }
 0x145   : > { %2068 = vmatmul.bf16.vlgmr.msrb.gmra.mxu3 %v1481_v13  ;;  %2165 = vmatpush.bf16.xpose.msrb.mxu2 %v2948_v43  ;;  %v1485_v54 = vpack.c.bf16 %v1443_v36, %v1403_v46  ;;  %v2979_v43 = vld [vmem:[%s3514_s18 + $0x98] sm:$0xf] }
 0x146   : > { %2179 = vmatpush.bf16.xpose.msrb.mxu3 %v2952_v12  ;;  %2151 = vmatpush.bf16.xpose.msrb.mxu1 %v2944_v52  ;;  %v3111_v52 = vld [vmem:[%s3514_s18 + $0x12c] sm:$0xf0]  ;;  %v2980_v61 = vor.u32 %v3112_v9, %v2979_v43 }
 0x147   : > { %v3998_v23 = vpop.f32.mrf.mxu2  ;;  %v2972_v3 = vor.u32 %v3111_v52, %v2971_v10 }
 0x148   : > { %v4000_v25 = vpop.f32.mrf.mxu3  ;;  %v4002_v14 = vpop.f32.mrf.mxu0  ;;  %v1326_v4 = vmul.f32 0.01, %v3998_v23 }
 0x149   : > { %v4005_v17 = vpop.f32.mrf.mxu1  ;;  %v1364_v57 = vmul.f32 0.01, %v4002_v14  ;;  %v1327_v5 = vmul.f32 0.01, %v4000_v25 }
 0x14a   : > { %v1365_v35 = vmul.f32 0.01, %v4005_v17 }
 0x14b   : > { %v1444_v1 = vmax.f32 %v4002_v14, %v1364_v57  ;;  %v1406_v14 = vmax.f32 %v3998_v23, %v1326_v4  ;;  %v1407_v29 = vmax.f32 %v4000_v25, %v1327_v5 }
 0x14c   : > { %v1445_v6 = vmax.f32 %v4005_v17, %v1365_v35  ;;  %v3091_v17 = vld [vmem:[%s3514_s18 + $0x94] sm:$0xf] }
 0x14d   : > { %v1486_v30 = vpack.c.bf16 %v1444_v1, %v1404_v50  ;;  %v2976_v8 = vor.u32 %v3091_v17, %v2973_v19 }
 0x14e   : > { %v1487_v24 = vpack.c.bf16 %v1445_v6, %v1405_v20 }
 0x14f   : > { %v4020_v37 = vpop.f32.mrf.mxu2 }
 0x150   : > { %v1181_v44 = vpop.f32.mrf.mxu3  ;;  %v4027_v40 = vpop.f32.mrf.mxu0  ;;  %v1366_v60 = vmul.f32 0.01, %v4020_v37 }
 0x151   : > { %v4032_v48 = vpop.f32.mrf.mxu1  ;;  %v1367_v2 = vmul.f32 0.01, %v1181_v44  ;;  %v1328_v18 = vmul.f32 0.01, %v4027_v40 }
 0x152   : > { %v1446_v7 = vmax.f32 %v4020_v37, %v1366_v60  ;;  %v1329_v38 = vmul.f32 0.01, %v4032_v48 }
 0x153   : > { %2082 = vmatmul.bf16.vlgmr.msra.gmra.mxu0 %v1482_v47  ;;  %2096 = vmatmul.bf16.vlgmr.msra.gmra.mxu1 %v1483_v49  ;;  %v1447_v12 = vmax.f32 %v1181_v44, %v1367_v2 }
 0x154   : > { %2110 = vmatmul.bf16.vlgmr.msra.gmra.mxu2 %v1484_v51  ;;  %2193 = vmatpush.bf16.xpose.msra.mxu0 %v2956_v28  ;;  %v1488_v31 = vpack.c.bf16 %v1446_v7, %v1406_v14  ;;  %v1409_v28 = vmax.f32 %v4032_v48, %v1329_v38 }
 0x155   : > { %2124 = vmatmul.bf16.vlgmr.msra.gmra.mxu3 %v1485_v54  ;;  %2221 = vmatpush.bf16.xpose.msra.mxu2 %v2964_v21  ;;  %v1489_v34 = vpack.c.bf16 %v1447_v12, %v1407_v29  ;;  %v1408_v21 = vmax.f32 %v4027_v40, %v1328_v18 }
 0x156   : > { %2235 = vmatpush.bf16.xpose.msra.mxu3 %v2968_v53  ;;  %2207 = vmatpush.bf16.xpose.msra.mxu1 %v2960_v32 }
 0x157   : > { %v4034_v63 = vpop.f32.mrf.mxu2 }
 0x158   : > { %v4036_v0 = vpop.f32.mrf.mxu3  ;;  %v4038_v56 = vpop.f32.mrf.mxu0  ;;  %v1330_v44 = vmul.f32 0.01, %v4034_v63 }
 0x159   : > { %v4041_v58 = vpop.f32.mrf.mxu1  ;;  %v1368_v36 = vmul.f32 0.01, %v4038_v56  ;;  %v1331_v45 = vmul.f32 0.01, %v4036_v0 }
 0x15a   : > { %v1369_v11 = vmul.f32 0.01, %v4041_v58  ;;  %v1410_v53 = vmax.f32 %v4034_v63, %v1330_v44 }
 0x15b   : > { %v1448_v41 = vmax.f32 %v4038_v56, %v1368_v36  ;;  %v1411_v57 = vmax.f32 %v4036_v0, %v1331_v45 }
 0x15c   : > { %v1449_v46 = vmax.f32 %v4041_v58, %v1369_v11 }
 0x15d   : > { %v1490_v35 = vpack.c.bf16 %v1448_v41, %v1408_v21 }
 0x15e   : > { %v1491_v62 = vpack.c.bf16 %v1449_v46, %v1409_v28 }
 0x15f   : > { %v1223_v13 = vpop.f32.mrf.mxu2 }
 0x160   : > { %v1237_v22 = vpop.f32.mrf.mxu3  ;;  %v4061_v27 = vpop.f32.mrf.mxu0  ;;  %v1370_v39 = vmul.f32 0.01, %v1223_v13 }
 0x161   : > { %v4066_v26 = vpop.f32.mrf.mxu1  ;;  %v1371_v42 = vmul.f32 0.01, %v1237_v22  ;;  %v1332_v43 = vmul.f32 0.01, %v4061_v27 }
 0x162   : > { %v1450_v47 = vmax.f32 %v1223_v13, %v1370_v39  ;;  %v1333_v10 = vmul.f32 0.01, %v4066_v26 }
 0x163   : > { %2138 = vmatmul.bf16.vlgmr.msrb.gmra.mxu0 %v1486_v30  ;;  %2152 = vmatmul.bf16.vlgmr.msrb.gmra.mxu1 %v1487_v24  ;;  %v1451_v49 = vmax.f32 %v1237_v22, %v1371_v42  ;;  %v1412_v55 = vmax.f32 %v4061_v27, %v1332_v43 }
 0x164   : > { %2166 = vmatmul.bf16.vlgmr.msrb.gmra.mxu2 %v1488_v31  ;;  %2249 = vmatpush.bf16.xpose.msrb.mxu0 %v2972_v3  ;;  %v1492_v2 = vpack.c.bf16 %v1450_v47, %v1410_v53  ;;  %v1413_v22 = vmax.f32 %v4066_v26, %v1333_v10 }
 0x165   : > { %2180 = vmatmul.bf16.vlgmr.msrb.gmra.mxu3 %v1489_v34  ;;  %2277 = vmatpush.bf16.xpose.msrb.mxu2 %v2980_v61  ;;  %v1493_v59 = vpack.c.bf16 %v1451_v49, %v1411_v57 }
 0x166   : > { %2291 = vmatpush.bf16.xpose.msrb.mxu3 %v2984_v33  ;;  %2263 = vmatpush.bf16.xpose.msrb.mxu1 %v2976_v8 }
 0x167   : > { %v4068_v23 = vpop.f32.mrf.mxu2 }
 0x168   : > { %v4070_v25 = vpop.f32.mrf.mxu3  ;;  %v1251_v15 = vpop.f32.mrf.mxu0  ;;  %v1334_v50 = vmul.f32 0.01, %v4068_v23 }
 0x169   : > { %v1265_v37 = vpop.f32.mrf.mxu1  ;;  %v1372_v5 = vmul.f32 0.01, %v1251_v15  ;;  %v1335_v12 = vmul.f32 0.01, %v4070_v25 }
 0x16a   : > { %v1373_v1 = vmul.f32 0.01, %v1265_v37  ;;  %v1414_v17 = vmax.f32 %v4068_v23, %v1334_v50 }
 0x16b   : > { %v1452_v13 = vmax.f32 %v1251_v15, %v1372_v5  ;;  %v1415_v61 = vmax.f32 %v4070_v25, %v1335_v12 }
 0x16c   : > { %v1453_v52 = vmax.f32 %v1265_v37, %v1373_v1 }
 0x16d   : > { %v1494_v24 = vpack.c.bf16 %v1452_v13, %v1412_v55 }
 0x16e   : > { %v1495_v33 = vpack.c.bf16 %v1453_v52, %v1413_v22 }
 0x16f   : > { %v1279_v51 = vpop.f32.mrf.mxu2 }
 0x170   : > { %v1293_v54 = vpop.f32.mrf.mxu3  ;;  %v1747_v32 = vpop.f32.mrf.mxu0  ;;  %v1374_v6 = vmul.f32 0.01, %v1279_v51 }
 0x171   : > { %v1761_v60 = vpop.f32.mrf.mxu1  ;;  %v1375_v9 = vmul.f32 0.01, %v1293_v54 }
 0x172   : > { %v1762_v56 = vadd.f32 %v1761_v60, %v1747_v32  ;;  %v1454_v16 = vmax.f32 %v1279_v51, %v1374_v6 }
 0x173   : > { %2194 = vmatmul.bf16.vlgmr.msra.gmra.mxu0 %v1490_v35  ;;  %2208 = vmatmul.bf16.vlgmr.msra.gmra.mxu1 %v1491_v62  ;;  %v1455_v20 = vmax.f32 %v1293_v54, %v1375_v9 }
 0x174   : > { %2222 = vmatmul.bf16.vlgmr.msra.gmra.mxu2 %v1492_v2  ;;  %v1496_v34 = vpack.c.bf16 %v1454_v16, %v1414_v17 }
 0x175   : > { %2236 = vmatmul.bf16.vlgmr.msra.gmra.mxu3 %v1493_v59  ;;  %v1497_v15 = vpack.c.bf16 %v1455_v20, %v1415_v61 }
 0x177   : > { %v1775_v40 = vpop.f32.mrf.mxu2 }
 0x178   : > { %v1776_v58 = vadd.f32 %v1775_v40, %v1762_v56  ;;  %v1789_v4 = vpop.f32.mrf.mxu3  ;;  %v1749_v48 = vpop.f32.mrf.mxu0 }
 0x179   : > { %v1763_v63 = vpop.f32.mrf.mxu1 }
 0x17a   : > { %v1790_v7 = vadd.f32 %v1789_v4, %v1776_v58  ;;  %v1764_v0 = vadd.f32 %v1763_v63, %v1749_v48 }
 0x17f   : > { %v1777_v14 = vpop.f32.mrf.mxu2 }
 0x180   : > { %v1778_v19 = vadd.f32 %v1777_v14, %v1764_v0  ;;  %v1791_v29 = vpop.f32.mrf.mxu3  ;;  %v1803_v30 = vpop.f32.mrf.mxu0 }
 0x181   : > { %v1804_v31 = vadd.f32 %v1803_v30, %v1790_v7  ;;  %v1817_v3 = vpop.f32.mrf.mxu1 }
 0x182   : > { %v1792_v8 = vadd.f32 %v1791_v29, %v1778_v19 }
 0x183   : > { %v1818_v36 = vadd.f32 %v1817_v3, %v1804_v31  ;;  %2250 = vmatmul.bf16.vlgmr.msrb.gmra.mxu0 %v1494_v24  ;;  %2264 = vmatmul.bf16.vlgmr.msrb.gmra.mxu1 %v1495_v33 }
 0x184   : > { %2278 = vmatmul.bf16.vlgmr.msrb.gmra.mxu2 %v1496_v34 }
 0x185   : > { %2292 = vmatmul.bf16.vlgmr.msrb.gmra.mxu3 %v1497_v15 }
 0x187   : > { %v1831_v27 = vpop.f32.mrf.mxu2 }
 0x188   : > { %v1832_v26 = vadd.f32 %v1831_v27, %v1818_v36  ;;  %v1845_v23 = vpop.f32.mrf.mxu3  ;;  %v1805_v37 = vpop.f32.mrf.mxu0 }
 0x189   : > { %v1806_v11 = vadd.f32 %v1805_v37, %v1792_v8  ;;  %v1819_v39 = vpop.f32.mrf.mxu1 }
 0x18a   : > { %v1846_v18 = vadd.f32 %v1845_v23, %v1832_v26 }
 0x18b   : > { %v1820_v25 = vadd.f32 %v1819_v39, %v1806_v11 }
 0x18f   : > { %v1833_v42 = vpop.f32.mrf.mxu2 }
 0x190   : > { %v1834_v38 = vadd.f32 %v1833_v42, %v1820_v25  ;;  %v1847_v44 = vpop.f32.mrf.mxu3  ;;  %v1859_v45 = vpop.f32.mrf.mxu0 }
 0x191   : > { %v1873_v41 = vpop.f32.mrf.mxu1  ;;  %v1860_v2 = vadd.f32 %v1859_v45, %v1846_v18 }
 0x192   : > { %v1848_v46 = vadd.f32 %v1847_v44, %v1834_v38 }
 0x193   : > { %v1874_v4 = vadd.f32 %v1873_v41, %v1860_v2 }
 0x197   : > { %v1887_v47 = vpop.f32.mrf.mxu2 }
 0x198   : > { %v1901_v21 = vpop.f32.mrf.mxu3  ;;  %v1861_v49 = vpop.f32.mrf.mxu0  ;;  %v1888_v48 = vadd.f32 %v1887_v47, %v1874_v4 }
 0x199   : > { %v1875_v51 = vpop.f32.mrf.mxu1  ;;  %v1862_v5 = vadd.f32 %v1861_v49, %v1848_v46 }
 0x19a   : > { %v1902_v1 = vadd.f32 %v1901_v21, %v1888_v48 }
 0x19b   : > { %v1876_v43 = vadd.f32 %v1875_v51, %v1862_v5 }
 0x19f   : > { %v1889_v28 = vpop.f32.mrf.mxu2 }
 0x1a0   : > { %v1903_v53 = vpop.f32.mrf.mxu3  ;;  %v1915_v54 = vpop.f32.mrf.mxu0  ;;  %v1890_v10 = vadd.f32 %v1889_v28, %v1876_v43 }
 0x1a1   : > { %v1929_v32 = vpop.f32.mrf.mxu1  ;;  %v1916_v9 = vadd.f32 %v1915_v54, %v1902_v1 }
 0x1a2   : > { %v1904_v13 = vadd.f32 %v1903_v53, %v1890_v10 }
 0x1a3   : > { %v1930_v50 = vadd.f32 %v1929_v32, %v1916_v9 }
 0x1a7   : > { %v1943_v57 = vpop.f32.mrf.mxu2 }
 0x1a8   : > { %v1957_v35 = vpop.f32.mrf.mxu3  ;;  %v1917_v60 = vpop.f32.mrf.mxu0  ;;  %v1944_v52 = vadd.f32 %v1943_v57, %v1930_v50 }
 0x1a9   : > { %v1931_v62 = vpop.f32.mrf.mxu1  ;;  %v1918_v14 = vadd.f32 %v1917_v60, %v1904_v13 }
 0x1aa   : > { %v1958_v22 = vadd.f32 %v1957_v35, %v1944_v52 }
 0x1ab   : > { %v1932_v17 = vadd.f32 %v1931_v62, %v1918_v14 }
 0x1af   : > { %v1945_v56 = vpop.f32.mrf.mxu2 }
 0x1b0   : > { %v1959_v59 = vpop.f32.mrf.mxu3  ;;  %v1971_v40 = vpop.f32.mrf.mxu0  ;;  %v1946_v30 = vadd.f32 %v1945_v56, %v1932_v17 }
 0x1b1   : > { %v1985_v58 = vpop.f32.mrf.mxu1  ;;  %v1972_v19 = vadd.f32 %v1971_v40, %v1958_v22 }
 0x1b2   : > { %v1960_v33 = vadd.f32 %v1959_v59, %v1946_v30 }
 0x1b3   : > { %v1986_v3 = vadd.f32 %v1985_v58, %v1972_v19 }
 0x1b7   : > { %v1999_v63 = vpop.f32.mrf.mxu2 }
 0x1b8   : > { %v2013_v6 = vpop.f32.mrf.mxu3  ;;  %v1973_v7 = vpop.f32.mrf.mxu0  ;;  %v2000_v34 = vadd.f32 %v1999_v63, %v1986_v3 }
 0x1b9   : > { %v1987_v0 = vpop.f32.mrf.mxu1  ;;  %v1974_v8 = vadd.f32 %v1973_v7, %v1960_v33 }
 0x1ba   : > { %v2014_v36 = vadd.f32 %v2013_v6, %v2000_v34 }
 0x1bb   : > { %v1988_v37 = vadd.f32 %v1987_v0, %v1974_v8 }
 0x1bf   : > { %v2001_v12 = vpop.f32.mrf.mxu2 }
 0x1c0   : > { %v2015_v16 = vpop.f32.mrf.mxu3  ;;  %v2027_v55 = vpop.f32.mrf.mxu0  ;;  %v2002_v39 = vadd.f32 %v2001_v12, %v1988_v37 }
 0x1c1   : > { %v2041_v20 = vpop.f32.mrf.mxu1  ;;  %v2028_v11 = vadd.f32 %v2027_v55, %v2014_v36 }
 0x1c2   : > { %v2016_v42 = vadd.f32 %v2015_v16, %v2002_v39 }
 0x1c3   : > { %v2042_v18 = vadd.f32 %v2041_v20, %v2028_v11  ;;  %v1456_v11 = vld [vmem:[#allocation8] sm:$0xff] }
 0x1c7   : > { %v2055_v29 = vpop.f32.mrf.mxu2 }
 0x1c8   : > { %v2069_v61 = vpop.f32.mrf.mxu3  ;;  %v2029_v24 = vpop.f32.mrf.mxu0  ;;  %v2056_v38 = vadd.f32 %v2055_v29, %v2042_v18 }
 0x1c9   : > { %v2043_v31 = vpop.f32.mrf.mxu1  ;;  %v2030_v46 = vadd.f32 %v2029_v24, %v2016_v42 }
 0x1ca   : > { %v2070_v47 = vadd.f32 %v2069_v61, %v2056_v38 }
 0x1cb   : > { %v2044_v21 = vadd.f32 %v2043_v31, %v2030_v46 }
 0x1cf   : > { %v2057_v15 = vpop.f32.mrf.mxu2 }
 0x1d0   : > { %v2071_v27 = vpop.f32.mrf.mxu3  ;;  %v2083_v26 = vpop.f32.mrf.mxu0  ;;  %v2058_v28 = vadd.f32 %v2057_v15, %v2044_v21 }
 0x1d1   : > { %v2097_v23 = vpop.f32.mrf.mxu1  ;;  %v2084_v49 = vadd.f32 %v2083_v26, %v2070_v47 }
 0x1d2   : > { %v2072_v35 = vadd.f32 %v2071_v27, %v2058_v28 }
 0x1d3   : > { %v2098_v57 = vadd.f32 %v2097_v23, %v2084_v49 }
 0x1d7   : > { %v2111_v25 = vpop.f32.mrf.mxu2 }
 0x1d8   : > { %v2125_v44 = vpop.f32.mrf.mxu3  ;;  %v2085_v45 = vpop.f32.mrf.mxu0  ;;  %v2112_v60 = vadd.f32 %v2111_v25, %v2098_v57 }
 0x1d9   : > { %v2099_v41 = vpop.f32.mrf.mxu1  ;;  %v2086_v62 = vadd.f32 %v2085_v45, %v2072_v35 }
 0x1da   : > { %v2126_v56 = vadd.f32 %v2125_v44, %v2112_v60 }
 0x1db   : > { %v2100_v4 = vadd.f32 %v2099_v41, %v2086_v62  ;;  %v1457_v41 = vld [vmem:[#allocation8 + $0x8] sm:$0xff] }
 0x1df   : > { %v2113_v51 = vpop.f32.mrf.mxu2 }
 0x1e0   : > { %v2127_v53 = vpop.f32.mrf.mxu3  ;;  %v2139_v54 = vpop.f32.mrf.mxu0  ;;  %v2114_v5 = vadd.f32 %v2113_v51, %v2100_v4 }
 0x1e1   : > { %v2153_v32 = vpop.f32.mrf.mxu1  ;;  %v2140_v48 = vadd.f32 %v2139_v54, %v2126_v56 }
 0x1e2   : > { %v2128_v6 = vadd.f32 %v2127_v53, %v2114_v5 }
 0x1e3   : > { %v2154_v63 = vadd.f32 %v2153_v32, %v2140_v48 }
 0x1e7   : > { %v2167_v2 = vpop.f32.mrf.mxu2 }
 0x1e8   : > { %v2181_v59 = vpop.f32.mrf.mxu3  ;;  %v2141_v40 = vpop.f32.mrf.mxu0  ;;  %v2168_v7 = vadd.f32 %v2167_v2, %v2154_v63 }
 0x1e9   : > { %v2155_v58 = vpop.f32.mrf.mxu1  ;;  %v2142_v10 = vadd.f32 %v2141_v40, %v2128_v6 }
 0x1ea   : > { %v2182_v50 = vadd.f32 %v2181_v59, %v2168_v7 }
 0x1eb   : > { %v2156_v12 = vadd.f32 %v2155_v58, %v2142_v10 }
 0x1ef   : > { %v2169_v1 = vpop.f32.mrf.mxu2 }
 0x1f0   : > { %v2183_v0 = vpop.f32.mrf.mxu3  ;;  %v2195_v43 = vpop.f32.mrf.mxu0  ;;  %v2170_v16 = vadd.f32 %v2169_v1, %v2156_v12 }
 0x1f1   : > { %v2209_v9 = vpop.f32.mrf.mxu1  ;;  %v2196_v13 = vadd.f32 %v2195_v43, %v2182_v50 }
 0x1f2   : > { %v2184_v17 = vadd.f32 %v2183_v0, %v2170_v16 }
 0x1f3   : > { %v2210_v22 = vadd.f32 %v2209_v9, %v2196_v13 }
 0x1f7   : > { %v2223_v52 = vpop.f32.mrf.mxu2 }
 0x1f8   : > { %v2237_v55 = vpop.f32.mrf.mxu3  ;;  %v2197_v20 = vpop.f32.mrf.mxu0  ;;  %v2224_v19 = vadd.f32 %v2223_v52, %v2210_v22 }
 0x1f9   : > { %v2211_v14 = vpop.f32.mrf.mxu1  ;;  %v2198_v29 = vadd.f32 %v2197_v20, %v2184_v17 }
 0x1fa   : > { %v2238_v61 = vadd.f32 %v2237_v55, %v2224_v19 }
 0x1fb   : > { %v2212_v3 = vadd.f32 %v2211_v14, %v2198_v29 }
 0x1ff   : > { %v2225_v30 = vpop.f32.mrf.mxu2 }
 0x200   : > { %v2239_v24 = vpop.f32.mrf.mxu3  ;;  %v2251_v31 = vpop.f32.mrf.mxu0  ;;  %v2226_v8 = vadd.f32 %v2225_v30, %v2212_v3 }
 0x201   : > { %v2252_v33 = vadd.f32 %v2251_v31, %v2238_v61  ;;  %v2265_v34 = vpop.f32.mrf.mxu1 }
 0x202   : > { %v2240_v27 = vadd.f32 %v2239_v24, %v2226_v8 }
 0x203   : > { %v2266_v15 = vadd.f32 %v2265_v34, %v2252_v33 }
 0x207   : > { %v2279_v36 = vpop.f32.mrf.mxu2 }
 0x208   : > { %v2280_v26 = vadd.f32 %v2279_v36, %v2266_v15  ;;  %v2293_v23 = vpop.f32.mrf.mxu3  ;;  %v2253_v37 = vpop.f32.mrf.mxu0 }
 0x209   : > { %v2254_v18 = vadd.f32 %v2253_v37, %v2240_v27  ;;  %v2267_v42 = vpop.f32.mrf.mxu1 }
 0x20a   : > { %v2294_v39 = vadd.f32 %v2293_v23, %v2280_v26 }
 0x20b   : > { %v2268_v38 = vadd.f32 %v2267_v42, %v2254_v18 }
 0x20c   : > { %v2298_v25 = vadd.f32 %v2294_v39, %v1456_v11 }
 0x20e   : > { %2301 = vst.msk [vmem:[#allocation8] sm:$0xff] %vm2300_vm2, %v2298_v25 }
 0x20f   : > { %v2281_v44 = vpop.f32.mrf.mxu2 }
 0x210   : > { %v2282_v45 = vadd.f32 %v2281_v44, %v2268_v38  ;;  %v2295_v46 = vpop.f32.mrf.mxu3 }
 0x212   : > { %v2296_v47 = vadd.f32 %v2295_v46, %v2282_v45  ;;  %2306 = sbr.rel (%p2985_p5) target bundleno = 809 (0x329), region = 52 }
 0x214   : > { %v2299_v21 = vadd.f32 %v2296_v47, %v1457_v41 }
 0x216   : > { %2302 = vst.msk [vmem:[#allocation8 + $0x8] sm:$0xff] %vm2300_vm2, %v2299_v21 }
 0x217   : > { %v2307_v49 = vld [vmem:[#allocation8] sm:$0xff] }
 0x218   : > { %v2309_v51 = vsel %vm2300_vm2, %v2307_v49, -inf }
 0x219   : > { %2310 = vmax.xlane.f32.xlu0 %v2309_v51 }
 0x21d   : > { %v2308_v28 = vld [vmem:[#allocation8 + $0x8] sm:$0xff] }
 0x21e   : > { %v2312_v53 = vsel %vm2300_vm2, %v2308_v28, -inf }
 0x221   : > { %2313 = vmax.xlane.f32.xlu0 %v2312_v53 }
 0x28c   : > { %v2311_v54 = vpop.xlane.xlu0 %2310 }
 0x28d   : > { %v2315_v32 = vsub.f32 %v2307_v49, %v2311_v54 }
 0x28f   : > { %v2317_v57 = vmul.f32 1.442695, %v2315_v32 }
 0x291   : > { %3187 = vpow2.f32 %v2317_v57 }
 0x294   : > { %v2314_v35 = vpop.xlane.xlu0 %2313 }
 0x295   : > { %v2316_v60 = vsub.f32 %v2308_v28, %v2314_v35 }
 0x297   : > { %v3188_v62 = vpop.eup %3187  ;;  %v2319_v2 = vmul.f32 1.442695, %v2316_v60 }
 0x298   : > { %v2321_v56 = vsel %vm2300_vm2, %v3188_v62, 0.0 }
 0x299   : > { %3189 = vpow2.f32 %v2319_v2  ;;  %2322 = vadd.xlane.f32.xlu1 %v2321_v56 }
 0x29f   : > { %v3190_v59 = vpop.eup %3189 }
 0x2a0   : > { %v2324_v40 = vsel %vm2300_vm2, %v3190_v59, 0.0 }
 0x2a1   : > { %2325 = vadd.xlane.f32.xlu1 %v2324_v40 }
 0x30c   : > { %v2323_v58 = vpop.xlane.xlu1 %2322 }
 0x30d   : > { %3191 = vrcp.f32 %v2323_v58  ;;  %v2338_v1 = vand.u32 2147483648, %v2323_v58  ;;  %v2336_v7 = vand.u32 2147483647, %v2323_v58  ;;  %vm2332_vm4 = vweird.f32 %v2323_v58 }
 0x30f   : > { %v2339_v9 = vor.u32 1.1754944e-38, %v2338_v1  ;;  %vm2337_vm6 = vcmp.eq.f32.partialorder %v2336_v7, 8.507059e+37 }
 0x313   : > { %v3192_v4 = vpop.eup %3191 }
 0x314   : > { %v2328_v48 = vmul.f32 %v3192_v4, %v2323_v58  ;;  %v2326_v5 = vpop.xlane.xlu1 %2325  ;;  %vm2333_vm3 = vweird.f32 %v3192_v4 }
 0x315   : > { %3193 = vrcp.f32 %v2326_v5  ;;  %vm2334_vm5 = vmor %vm2332_vm4, %vm2333_vm3  ;;  %v2353_v16 = vand.u32 2147483648, %v2326_v5  ;;  %v2351_v20 = vand.u32 2147483647, %v2326_v5  ;;  %vm2347_vm8 = vweird.f32 %v2326_v5 }
 0x316   : > { %v2329_v63 = vsub.f32 1.0, %v2328_v48 }
 0x317   : > { %v2354_v22 = vor.u32 1.1754944e-38, %v2353_v16  ;;  %vm2352_vm10 = vcmp.eq.f32.partialorder %v2351_v20, 8.507059e+37 }
 0x318   : > { %v2330_v6 = vmul.f32 %v3192_v4, %v2329_v63 }
 0x31a   : > { %v2331_v0 = vadd.f32 %v3192_v4, %v2330_v6 }
 0x31b   : > { %v3194_v43 = vpop.eup %3193 }
 0x31c   : > { %v2335_v10 = vsel %vm2334_vm5, %v3192_v4, %v2331_v0  ;;  %v2343_v50 = vmul.f32 %v3194_v43, %v2326_v5  ;;  %vm2348_vm7 = vweird.f32 %v3194_v43 }
 0x31d   : > { %v2340_v12 = vsel %vm2337_vm6, %v2339_v9, %v2335_v10  ;;  %vm2349_vm9 = vmor %vm2347_vm8, %vm2348_vm7 }
 0x31e   : > { %v2341_v13 = vmul.f32 %v3188_v62, %v2340_v12  ;;  %v2344_v52 = vsub.f32 1.0, %v2343_v50 }
 0x320   : > { %2357 = vst.msk [vmem:[#allocation8] sm:$0xff] %vm2300_vm2, %v2341_v13  ;;  %v2345_v55 = vmul.f32 %v3194_v43, %v2344_v52 }
 0x322   : > { %v2346_v14 = vadd.f32 %v3194_v43, %v2345_v55 }
 0x324   : > { %v2350_v17 = vsel %vm2349_vm9, %v3194_v43, %v2346_v14 }
 0x325   : > { %v2355_v19 = vsel %vm2352_vm10, %v2354_v22, %v2350_v17 }
 0x326   : > { %v2356_v29 = vmul.f32 %v3190_v59, %v2355_v19 }
 0x328   : > { %2358 = vst.msk [vmem:[#allocation8 + $0x8] sm:$0xff] %vm2300_vm2, %v2356_v29 }
 0x329 PF: > { %p3143_p7 = scmp.eq.s32.totalorder %s3454_s26, 1  ;;  %s3364_s20 = smov [#allocation8]  }
 0x32a   : > { %s2364_s21 = sshll.u32 %s3364_s20, 4  ;;  %s2366_s4 = sshll.u32 %s4121_s3, 4  ;;  %s2365_s21 = int_to_ptr.vmem [resolvable:$true] %s2364_s21  ;;  %s2367_s4 = int_to_ptr.hbm [resolvable:$true] %s2366_s4 }
 0x32b   : > { %s3365_s10 = smov 128   ;;  %s3366_s11 = smov 8  }
 0x32c   : > { %3126 = dma.vmem_to_hbm [thread:$0]  (%p3143_p7), %s2365_s21, 256, %s2367_s4, [#allocation4], %s3365_s10, %s3365_s10, %s3366_s11  }
 0x32d   : > { %3338 = dma.done.wait (%p3143_p7), [#allocation4], 256  }
 0x32e   : > { %3340 = vsyncadd (%p3143_p7), [#allocation4], 4294967040 }
 0x32f PF: > { %p15_p1 = scmp.ge.s32.totalorder %s3408_s16, 4   ;;  %s4125_s12 = smov %s3347_s13 }
 0x330   : > { %s4126_s13 = smov %s3351_s14  ;;  %s4127_s14 = smov %s3418_s19 }
 0x331   : > { %s4128_s15 = smov %s3408_s16  ;;  %17 = sbr.rel (!%p15_p1) target bundleno = 5 (0x5), region = 93 }
 0x336   :  { %2383 = vsyncpa [#allocation3], 1 }
 0x337   :  { %2385 = vsyncpa [#allocation3 + $0x1], 1 }
 0x338   :  { %2386 = vsyncpa [#allocation6], 1 }
 0x339   :  { %2388 = vsyncpa [#allocation6 + $0x1], 1 }
 0x33a   :  { %2389 = vsyncpa [#allocation4], 1 }
 0x33b   :  { %2391 = vsyncpa [#allocation4 + $0x1], 1 }

</bundles_post_ra>
